<compile_context>
chip_gen: v7x
topology: tpu7x:2x2x1
jax: 0.10.0
libtpu: 0.0.40
codegen_flags: <defaults>
</compile_context>

<pallas_src>
import functools
import math

import jax
import jax.numpy as jnp
from jax.experimental import pallas as pl
from jax.experimental.pallas import tpu as pltpu


_NEG_INF = -1e30
_VMEM_LIMIT = 32 * 1024 * 1024   # above v5e's 16 MiB default, safe on v7x (64 MiB phys)


def _sublane_align(dtype) -> int:
    """Sublane tile alignment: 8 rows for 4-byte, 16 for 2-byte, 32 for 1-byte."""
    return {4: 8, 2: 16, 1: 32}.get(jnp.dtype(dtype).itemsize, 8)


def _pick_tile(n: int, preferred: int, align: int) -> int:
    """Largest tile <= preferred that divides n and is a multiple of `align`.
    Falls back to the full extent (always a legal block shape), but refuses to
    silently produce a huge single block."""
    if n <= preferred:
        return n
    t = (preferred // align) * align
    while t >= align:
        if n % t == 0:
            return t
        t -= align
    if n > 4096:
        raise ValueError(
            f"no aligned tile <= {preferred} divides extent {n}; refusing to "
            f"fall back to a single {n}-wide block (VMEM risk).")
    return n


# -----------------------------------------------------------------------------
# Tiled NT matmul kernel:  a (M, K) @ b (N, K)^T  [+ bias]  -> (M, N)
# (b is the PyTorch nn.Linear weight layout; no transpose is materialized.)
# -----------------------------------------------------------------------------
def _matmul_nt_kernel(*refs, has_bias: bool):
    if has_bias:
        a_ref, b_ref, bias_ref, o_ref, acc_ref = refs
    else:
        a_ref, b_ref, o_ref, acc_ref = refs
        bias_ref = None

    @pl.when(pl.program_id(2) == 0)
    def _():
        acc_ref[...] = jnp.zeros_like(acc_ref)

    acc_ref[...] += jax.lax.dot_general(
        a_ref[...], b_ref[...], (((1,), (1,)), ((), ())),
        preferred_element_type=jnp.float32)

    @pl.when(pl.program_id(2) == pl.num_programs(2) - 1)
    def _():
        out = acc_ref[...]
        if has_bias:
            out = out + bias_ref[...].astype(jnp.float32)
        o_ref[...] = out.astype(o_ref.dtype)


def matmul_nt(a: jax.Array, b: jax.Array, bias=None, *, tm=256, tn=256, tk=512):
    """a: (M, K), b: (N, K) -> a @ b.T (+ bias), f32 accumulation on the MXU."""
    M, K = a.shape
    N, K2 = b.shape
    assert K == K2
    tm = _pick_tile(M, tm, _sublane_align(a.dtype))
    tn = _pick_tile(N, tn, 128)
    tk = _pick_tile(K, tk, 128)
    grid = (M // tm, N // tn, K // tk)

    in_specs = [
        pl.BlockSpec((tm, tk), lambda i, j, k: (i, k)),
        pl.BlockSpec((tn, tk), lambda i, j, k: (j, k)),
    ]
    args = [a, b]
    if bias is not None:
        in_specs.append(pl.BlockSpec((1, tn), lambda i, j, k: (0, j)))
        args.append(bias.reshape(1, N))

    kernel = functools.partial(_matmul_nt_kernel, has_bias=bias is not None)
    return pl.pallas_call(
        kernel,
        out_shape=jax.ShapeDtypeStruct((M, N), a.dtype),
        grid_spec=pltpu.PrefetchScalarGridSpec(
            num_scalar_prefetch=0,
            grid=grid,
            in_specs=in_specs,
            out_specs=pl.BlockSpec((tm, tn), lambda i, j, k: (i, j)),
            scratch_shapes=[pltpu.VMEM((tm, tn), jnp.float32)],
        ),
        compiler_params=pltpu.CompilerParams(
            dimension_semantics=("parallel", "parallel", "arbitrary"),
            vmem_limit_bytes=_VMEM_LIMIT),
    )(*args)


# -----------------------------------------------------------------------------
# Causal flash-attention kernel on the (B, S, H*D) layout (transpose-free),
# grid over kv-head groups so K/V DMAs are shared by all q-heads of a group.
# -----------------------------------------------------------------------------
def _flash_kernel(q_ref, k_ref, v_ref, o_ref, m_sc, l_sc, acc_sc,
                  *, scale: float, tq: int, tkv: int, hg: int, d: int):
    qi = pl.program_id(2)
    ki = pl.program_id(3)

    @pl.when(ki == 0)
    def _():
        m_sc[...] = jnp.full_like(m_sc, _NEG_INF)
        l_sc[...] = jnp.zeros_like(l_sc)
        acc_sc[...] = jnp.zeros_like(acc_sc)

    q_first = qi * tq
    q_last = q_first + (tq - 1)
    kv_first = ki * tkv
    kv_last = kv_first + (tkv - 1)

    def update(apply_mask: bool):
        q_all = q_ref[0]                      # (tq, hg*d), native dtype
        k = k_ref[0]                          # (tkv, d),   native dtype
        v = v_ref[0]                          # (tkv, d)
        if apply_mask:
            row = q_first + jax.lax.broadcasted_iota(jnp.int32, (tq, tkv), 0)
            col = kv_first + jax.lax.broadcasted_iota(jnp.int32, (tq, tkv), 1)
            mask = row >= col
        for h in range(hg):                   # q-heads sharing this K/V block
            qh = q_all[:, h * d:(h + 1) * d]                    # (tq, d)
            s = jax.lax.dot_general(
                qh, k, (((1,), (1,)), ((), ())),
                preferred_element_type=jnp.float32) * scale     # (tq, tkv) f32
            if apply_mask:
                s = jnp.where(mask, s, _NEG_INF)
            m_prev = m_sc[:, h:h + 1]
            m_new = jnp.maximum(m_prev, s.max(axis=-1, keepdims=True))
            alpha = jnp.exp(m_prev - m_new)
            p = jnp.exp(s - m_new)
            l_sc[:, h:h + 1] = alpha * l_sc[:, h:h + 1] + p.sum(-1, keepdims=True)
            acc_sc[:, h * d:(h + 1) * d] = (
                alpha * acc_sc[:, h * d:(h + 1) * d]
                + jax.lax.dot_general(
                    p.astype(v.dtype), v, (((1,), (0,)), ((), ())),
                    preferred_element_type=jnp.float32))
            m_sc[:, h:h + 1] = m_new

    # Block entirely below the causal diagonal: no mask arithmetic needed.
    @pl.when(kv_last <= q_first)
    def _():
        update(apply_mask=False)

    # Block straddling the diagonal: apply the causal mask.
    @pl.when(jnp.logical_and(kv_first <= q_last, kv_last > q_first))
    def _():
        update(apply_mask=True)

    # (fully-masked blocks: neither branch fires and the DMA was elided by the
    #  clamped K/V index_map)

    @pl.when(ki == pl.num_programs(3) - 1)
    def _():
        inv_l = pl.reciprocal(l_sc[...], approx=True)           # (tq, hg), EUP
        for h in range(hg):
            o_ref[0, :, h * d:(h + 1) * d] = (
                acc_sc[:, h * d:(h + 1) * d] * inv_l[:, h:h + 1]
            ).astype(o_ref.dtype)


def flash_attention_causal(q, k, v, *, n_head, n_kv_heads, head_dim,
                           tq_pref=512, tkv_pref=256):
    """q: (B, S, n_head*head_dim); k, v: (B, S, n_kv_heads*head_dim).
    Causal scaled-dot-product attention with GQA; output (B, S, n_head*head_dim)."""
    B, S, qdim = q.shape
    assert qdim == n_head * head_dim
    assert k.shape == (B, S, n_kv_heads * head_dim) and v.shape == k.shape
    assert n_head % n_kv_heads == 0
    if head_dim % 128 != 0:
        raise ValueError("flash_attention_causal requires head_dim % 128 == 0")
    rep = n_head // n_kv_heads
    scale = 1.0 / math.sqrt(head_dim)

    tq = _pick_tile(S, tq_pref, _sublane_align(q.dtype))
    tkv = _pick_tile(S, tkv_pref, _sublane_align(k.dtype))

    # Q-head group size per kernel invocation: the whole GQA group when it fits
    # comfortably in VMEM (must divide rep so each group maps to one kv head).
    hg = rep
    while hg > 1 and (hg * head_dim > 1024 or rep % hg != 0):
        hg -= 1
    G = n_head // hg
    grid = (B, G, S // tq, S // tkv)

    def q_map(b, g, qi, ki):
        return (b, qi, g)

    def kv_map(b, g, qi, ki):
        # Clamp to the causal bound: fully-masked kv steps map to the same
        # block as the previous step, so Pallas elides the DMA entirely.
        ki_causal = jnp.minimum(ki, (qi * tq + tq - 1) // tkv)
        return (b, ki_causal, (g * hg) // rep)

    kernel = functools.partial(_flash_kernel, scale=scale, tq=tq, tkv=tkv,
                               hg=hg, d=head_dim)

    return pl.pallas_call(
        kernel,
        out_shape=jax.ShapeDtypeStruct((B, S, n_head * head_dim), q.dtype),
        grid_spec=pltpu.PrefetchScalarGridSpec(
            num_scalar_prefetch=0,
            grid=grid,
            in_specs=[
                pl.BlockSpec((1, tq, hg * head_dim), q_map),
                pl.BlockSpec((1, tkv, head_dim), kv_map),
                pl.BlockSpec((1, tkv, head_dim), kv_map),
            ],
            out_specs=pl.BlockSpec((1, tq, hg * head_dim), q_map),
            scratch_shapes=[
                pltpu.VMEM((tq, hg), jnp.float32),               # running max
                pltpu.VMEM((tq, hg), jnp.float32),               # running denom
                pltpu.VMEM((tq, hg * head_dim), jnp.float32),    # f32 accumulator
            ],
        ),
        compiler_params=pltpu.CompilerParams(
            dimension_semantics=("parallel", "parallel", "parallel",
                                 "arbitrary"),
            vmem_limit_bytes=_VMEM_LIMIT),
    )(q, k, v)


# -----------------------------------------------------------------------------
# RoPE + module wrapper
# -----------------------------------------------------------------------------
def apply_rotary_emb(x: jax.Array, freqs_cis: jax.Array) -> jax.Array:
    # x: (bsz, seq, heads, head_dim); freqs_cis: (seq, head_dim // 2, 2)
    xf = x.astype(jnp.float32)
    xs = xf.reshape(x.shape[:-1] + (-1, 2))
    fc = freqs_cis.reshape(1, xs.shape[1], 1, xs.shape[3], 2).astype(jnp.float32)
    out = jnp.stack(
        [xs[..., 0] * fc[..., 0] - xs[..., 1] * fc[..., 1],
         xs[..., 1] * fc[..., 0] + xs[..., 0] * fc[..., 1]],
        axis=-1)
    return out.reshape(x.shape).astype(x.dtype)


def precompute_freqs_cis(seq_len: int, n_elem: int, base: float = 10000.0):
    freqs = 1.0 / (base ** (jnp.arange(0, n_elem, 2, dtype=jnp.float32)
                            [: n_elem // 2] / n_elem))
    t = jnp.arange(seq_len, dtype=jnp.float32)
    ang = jnp.outer(t, freqs)
    return jnp.stack([jnp.cos(ang), jnp.sin(ang)], axis=-1)  # (S, n_elem//2, 2)


def attention_forward(x, wqkv_w, wo_w, freqs_cis, *,
                      n_head, n_local_heads, head_dim, qkv_bias=None,
                      attn_block_q=512, attn_block_kv=256):
    bsz, seqlen, dim = x.shape
    assert dim == n_head * head_dim
    kv_size = n_local_heads * head_dim

    # QKV projection: Pallas NT matmul (weight stays in PyTorch (N, K) layout,
    # bias fused into the kernel epilogue).
    qkv = matmul_nt(x.reshape(bsz * seqlen, dim), wqkv_w, bias=qkv_bias)
    q, k, v = jnp.split(qkv, [dim, dim + kv_size], axis=-1)

    # RoPE (elementwise; stays in (B, S, H, D) layout -> no transposes).
    q = apply_rotary_emb(q.reshape(bsz, seqlen, n_head, head_dim), freqs_cis)
    k = apply_rotary_emb(k.reshape(bsz, seqlen, n_local_heads, head_dim),
                         freqs_cis)
    q = q.reshape(bsz, seqlen, dim)
    k = k.reshape(bsz, seqlen, kv_size)
    v = v.reshape(bsz, seqlen, kv_size)

    # Causal flash attention (GQA folded into the index_map, transpose-free).
    y = flash_attention_causal(q, k, v, n_head=n_head,
                               n_kv_heads=n_local_heads, head_dim=head_dim,
                               tq_pref=attn_block_q, tkv_pref=attn_block_kv)

    # Output projection (Pallas NT matmul).
    out = matmul_nt(y.reshape(bsz * seqlen, dim), wo_w)
    return out.reshape(bsz, seqlen, dim)


# -----------------------------------------------------------------------------
# Plain-JAX reference for correctness checking
# -----------------------------------------------------------------------------
def reference_attention(x, wqkv_w, wo_w, freqs_cis, *,
                        n_head, n_local_heads, head_dim, qkv_bias=None):
    bsz, seqlen, dim = x.shape
    kv_size = n_local_heads * head_dim
    qkv = x.reshape(bsz * seqlen, dim) @ wqkv_w.T
    if qkv_bias is not None:
        qkv = qkv + qkv_bias
    q, k, v = jnp.split(qkv, [dim, dim + kv_size], axis=-1)
    q = q.reshape(bsz, seqlen, n_head, head_dim)
    k = k.reshape(bsz, seqlen, n_local_heads, head_dim)
    v = v.reshape(bsz, seqlen, n_local_heads, head_dim)
    q = apply_rotary_emb(q, freqs_cis)
    k = apply_rotary_emb(k, freqs_cis)
    q, k, v = (t.transpose(0, 2, 1, 3) for t in (q, k, v))
    rep = n_head // n_local_heads
    k = jnp.repeat(k, rep, axis=1)
    v = jnp.repeat(v, rep, axis=1)
    scale = 1.0 / math.sqrt(head_dim)
    s = jnp.einsum("bhqd,bhkd->bhqk", q, k) * scale
    causal = jnp.tril(jnp.ones((seqlen, seqlen), dtype=bool))
    s = jnp.where(causal[None, None], s, -jnp.inf)
    p = jax.nn.softmax(s, axis=-1)
    y = jnp.einsum("bhqk,bhkd->bhqd", p, v)
    y = y.transpose(0, 2, 1, 3).reshape(bsz * seqlen, dim)
    return (y @ wo_w.T).reshape(bsz, seqlen, dim)


def _run_case(key, *, batch, seq, n_head, n_local_heads, head_dim,
              use_bias, attn_block_q, attn_block_kv):
    dim = n_head * head_dim
    total_head_dim = (n_head + 2 * n_local_heads) * head_dim
    kx, kq, ko, kb = jax.random.split(key, 4)
    x = jax.random.normal(kx, (batch, seq, dim), dtype=jnp.float32)
    bound = 1.0 / math.sqrt(dim)   # nn.Linear default init range
    wqkv_w = jax.random.uniform(kq, (total_head_dim, dim), jnp.float32,
                                -bound, bound)
    wo_w = jax.random.uniform(ko, (dim, dim), jnp.float32, -bound, bound)
    bias = (jax.random.uniform(kb, (total_head_dim,), jnp.float32,
                               -bound, bound) if use_bias else None)
    freqs_cis = precompute_freqs_cis(seq, head_dim)

    out = attention_forward(x, wqkv_w, wo_w, freqs_cis,
                            n_head=n_head, n_local_heads=n_local_heads,
                            head_dim=head_dim, qkv_bias=bias,
                            attn_block_q=attn_block_q,
                            attn_block_kv=attn_block_kv)
    out = jax.block_until_ready(out)

    ref = reference_attention(x, wqkv_w, wo_w, freqs_cis,
                              n_head=n_head, n_local_heads=n_local_heads,
                              head_dim=head_dim, qkv_bias=bias)
    ref = jax.block_until_ready(ref)

    assert out.shape == ref.shape and out.dtype == ref.dtype
    max_err = float(jnp.max(jnp.abs(out - ref)))
    assert jnp.allclose(out, ref, atol=2e-2, rtol=2e-2), max_err


if __name__ == "__main__":
    key = jax.random.PRNGKey(0)
    k1, k2 = jax.random.split(key)

    # Case 1: GQA (rep=2), multi-block causal grid -> exercises head-group K/V
    # reuse, the clamped/elided K/V DMAs, and band/full/masked block paths.
    _run_case(k1, batch=2, seq=256, n_head=4, n_local_heads=2, head_dim=128,
              use_bias=False, attn_block_q=64, attn_block_kv=64)

    # Case 2: MHA (rep=1) with fused qkv bias, single-block sequence.
    _run_case(k2, batch=1, seq=128, n_head=2, n_local_heads=2, head_dim=128,
              use_bias=True, attn_block_q=512, attn_block_kv=256)

    print("KERNEL_OK")
</pallas_src>

<mosaic_0001>
module attributes {stable_mosaic.version = 11 : i64} {
  func.func @_matmul_nt_kernel(%arg0: i32, %arg1: i32, %arg2: i32, %arg3: memref<256x512xf32, #tpu.memory_space<vmem>>, %arg4: memref<256x512xf32, #tpu.memory_space<vmem>>, %arg5: memref<256x256xf32, #tpu.memory_space<vmem>>, %arg6: memref<256x256xf32, #tpu.memory_space<vmem>>) attributes {dimension_semantics = [#tpu.dimension_semantics<parallel>, #tpu.dimension_semantics<parallel>, #tpu.dimension_semantics<arbitrary>], iteration_bounds = array<i64: 2, 4, 1>, scalar_prefetch = 0 : i64, scratch_operands = 1 : i64, tpu.core_type = #tpu.core_type<tc>, window_params = [{transform_indices = @transform_0, window_bounds = array<i64: 256, 512>}, {transform_indices = @transform_1, window_bounds = array<i64: 256, 512>}, {transform_indices = @transform_2, window_bounds = array<i64: 256, 256>}]} {
    %c0_i32 = arith.constant 0 : i32
    %0 = arith.cmpi eq, %arg2, %c0_i32 : i32
    %1 = arith.extui %0 : i1 to i32
    %c0_i32_0 = arith.constant 0 : i32
    %2 = arith.cmpi ne, %1, %c0_i32_0 : i32
    scf.if %2 {
      %cst_10 = arith.constant 0.000000e+00 : f32
      %12 = vector.broadcast %cst_10 : f32 to vector<256x256xf32>
      %c0_11 = arith.constant 0 : index
      %c0_12 = arith.constant 0 : index
      %13 = vector.load %arg6[%c0_11, %c0_12] : memref<256x256xf32, #tpu.memory_space<vmem>>, vector<256x256xf32>
      tpu.vector_store %arg6[%c0_11, %c0_12], %12 {strides = array<i32>} : memref<256x256xf32, #tpu.memory_space<vmem>>, vector<256x256xf32>,
    } else {
    }
    %c0 = arith.constant 0 : index
    %c0_1 = arith.constant 0 : index
    %3 = vector.load %arg6[%c0, %c0_1] : memref<256x256xf32, #tpu.memory_space<vmem>>, vector<256x256xf32>
    %c0_2 = arith.constant 0 : index
    %c0_3 = arith.constant 0 : index
    %4 = vector.load %arg3[%c0_2, %c0_3] : memref<256x512xf32, #tpu.memory_space<vmem>>, vector<256x512xf32>
    %c0_4 = arith.constant 0 : index
    %c0_5 = arith.constant 0 : index
    %5 = vector.load %arg4[%c0_4, %c0_5] : memref<256x512xf32, #tpu.memory_space<vmem>>, vector<256x512xf32>
    %cst = arith.constant dense<0.000000e+00> : vector<256x256xf32>
    %6 = tpu.matmul %4, %5, %cst {dimension_numbers = #tpu.dot_dimension_numbers<[1], [1], [0], [0], [0, 0, 1, 0], [], []>} : vector<256x512xf32>, vector<256x512xf32>, vector<256x256xf32> -> vector<256x256xf32>
    %7 = arith.addf %3, %6 : vector<256x256xf32>
    %c0_6 = arith.constant 0 : index
    %c0_7 = arith.constant 0 : index
    %8 = vector.load %arg6[%c0_6, %c0_7] : memref<256x256xf32, #tpu.memory_space<vmem>>, vector<256x256xf32>
    tpu.vector_store %arg6[%c0_6, %c0_7], %7 {strides = array<i32>} : memref<256x256xf32, #tpu.memory_space<vmem>>, vector<256x256xf32>,
    %c0_i32_8 = arith.constant 0 : i32
    %9 = arith.cmpi eq, %arg2, %c0_i32_8 : i32
    %10 = arith.extui %9 : i1 to i32
    %c0_i32_9 = arith.constant 0 : i32
    %11 = arith.cmpi ne, %10, %c0_i32_9 : i32
    scf.if %11 {
      %c0_10 = arith.constant 0 : index
      %c0_11 = arith.constant 0 : index
      %12 = vector.load %arg6[%c0_10, %c0_11] : memref<256x256xf32, #tpu.memory_space<vmem>>, vector<256x256xf32>
      %c0_12 = arith.constant 0 : index
      %c0_13 = arith.constant 0 : index
      %13 = vector.load %arg5[%c0_12, %c0_13] : memref<256x256xf32, #tpu.memory_space<vmem>>, vector<256x256xf32>
      tpu.vector_store %arg5[%c0_12, %c0_13], %12 {strides = array<i32>} : memref<256x256xf32, #tpu.memory_space<vmem>>, vector<256x256xf32>,
    } else {
    }
    return
  }
  func.func @transform_0(%arg0: i32, %arg1: i32, %arg2: i32) -> (i32, i32) {
    %c0_i32 = arith.constant 0 : i32
    return %arg0, %arg2 : i32, i32
  }
  func.func @transform_1(%arg0: i32, %arg1: i32, %arg2: i32) -> (i32, i32) {
    %c0_i32 = arith.constant 0 : i32
    return %arg1, %arg2 : i32, i32
  }
  func.func @transform_2(%arg0: i32, %arg1: i32, %arg2: i32) -> (i32, i32) {
    %c0_i32 = arith.constant 0 : i32
    return %arg0, %arg1 : i32, i32
  }
}

</mosaic_0001>

<bundles_post_ra>
// kernel: tpu_custom_call.1
= control target key start
LH: loop header
LB: loop body
LE: loop exit
PB: predicated region body
PF: predicated region fallthrough
CT: control target
= control target key end

     0   :  { %s2805_s0 = inlined_call_operand.hbm [shape: f32[512,512], index: 0, kind: input, shape index: {}]   ;;  %s2806_s1 = inlined_call_operand.hbm [shape: f32[1024,512], index: 1, kind: input, shape index: {}]   ;;  %s2807_s2 = inlined_call_operand.hbm [shape: f32[512,1024], index: 2, kind: output, shape index: {}]  }
   0x1   :  { %2819 = sst [smem:[#allocation16_spill]] %s2805_s0 }
   0x2   :  { %7 = vsyncpa [#allocation4], 0 }
   0x3   :  { %9 = vsyncpa [#allocation4 + $0x1], 0 }
   0x4   :  { %10 = vsyncpa [#allocation7], 0 }
   0x5   :  { %12 = vsyncpa [#allocation7 + $0x1], 0 }
   0x6   :  { %13 = vsyncpa [#allocation5], 0 }
   0x7   :  { %15 = vsyncpa [#allocation5 + $0x1], 0  ;;  %s2127_s9 = smov 0   ;;  %s2129_s10 = smov 0  }
   0x8   :  { %s2131_s11 = smov 0   ;;  %s2133_s12 = smov 0  }
   0x9   :  { %s2135_s13 = smov 0   ;;  %s2137_s14 = smov 0  }
   0xa   :  { %s2139_s15 = smov 0   ;;  %s2141_s16 = smov 0  }
   0xb   :  { %s2143_s17 = smov 0   ;;  %s2145_s18 = smov 0  }
   0xc   :  { %s2147_s19 = smov 0   ;;  %s2149_s20 = smov 0  }
   0xd   :  { %s2151_s21 = smov 0   ;;  %s2153_s22 = smov 0  }
   0xe LB: > { %2820 = sst [smem:[#allocation12_spill]] %s2094_s20  ;;  %s1536_s23 = sadd.s32 4294967295, %s2102_s22   ;;  %s2102_s22 = sphi %s2153_s22, %s21_s22   ;;  %s2098_s21 = sphi %s2151_s21, %s2847_s21   ;;  %s2094_s20 = sphi %s2149_s20, %s2846_s20   ;;  %s2090_s19 = sphi %s2147_s19, %s2845_s19   ;;  %s2086_s18 = sphi %s2145_s18, %s2844_s18   ;;  %s2082_s17 = sphi %s2143_s17, %s2856_s17   ;;  %s2078_s16 = sphi %s2141_s16, %s2855_s16   ;;  %s2074_s15 = sphi %s2139_s15, %s2854_s15   ;;  %s2070_s14 = sphi %s2137_s14, %s2853_s14   ;;  %s2066_s13 = sphi %s2135_s13, %s2852_s13   ;;  %s2062_s12 = sphi %s2133_s12, %s2851_s12   ;;  %s2058_s11 = sphi %s2131_s11, %s2850_s11   ;;  %s2054_s10 = sphi %s2129_s10, %s2849_s10   ;;  %s2050_s9 = sphi %s2127_s9, %s2848_s9  }
   0xf   : > { %2821 = sst [smem:[#allocation13_spill]] %s2098_s21  ;;  %s40_s24 = sadd.s32 1, %s2098_s21 }
  0x10   : > { %p56_p0 = scmp.ne.s32.totalorder %s2082_s17, %s2078_s16  ;;  %p2809_p1 = scmp.eq.s32.totalorder %s2102_s22, 0 }
  0x11   : > { %p62_p2 = scmp.ne.s32.totalorder %s2078_s16, %s2074_s15  ;;  %p2204_p3 = scmp.eq.s32.totalorder %s1536_s23, 0 }
  0x12   : > { %p58_p4 = por %p2809_p1, %p56_p0  ;;  %p2808_p6 = scmp.lt.s32.totalorder %s2102_s22, 8 }
  0x13   : > { %p2212_p5 = por %p2204_p3, %p62_p2  ;;  %s142_s28 = sand.u32 1, %s2082_s17  }
  0x14   : > { %s1560_s29 = sshll.u32 %s2098_s21, 14  ;;  %s1540_s30 = sshll.u32 %s142_s28, 10 }
  0x15   : > { %s2823_s27 = scalar_select %p2212_p5, 1, 0 }
  0x16   : > { %s2824_s0 = sld [smem:[#allocation16_spill]]  ;;  %s146_s6 = scalar_lea.vmem [#allocation3], %s1540_s30 }
  0x17   : > { %s156_s7 = sshll.u32 %s146_s6, 4  ;;  %p2226_p7 = pnand %p2808_p6, %p58_p4  ;;  %s2230_s7 = int_to_ptr.vmem [resolvable:$true] %s156_s7 }
  0x18   : > { %s2232_s15 = scalar_lea.sflag [#allocation4], %s142_s28 }
  0x19   : > { %p1894_p9 = pneg %p2226_p7 }
  0x1c   : > { %s2222_s5 = scalar_lea.hbm %s2824_s0, %s1560_s29  ;;  %s1897_s4 = scalar_lea.hbm %s2824_s0, 32768 }
  0x1d   : > { %s1892_s3 = scalar_lea.hbm %s2222_s5, 16384  ;;  %p1898_p12 = scmp.lt.u32.totalorder %s2222_s5, %s2824_s0 }
  0x1e   : > { %p1893_p8 = scmp.ne.s32.totalorder %s2222_s5, %s1892_s3  ;;  %p1899_p13 = scmp.lt.u32.totalorder %s1897_s4, %s1892_s3 }
  0x1f   : > { %p1901_p2 = scmp.lt.u32.totalorder %s1892_s3, %s2222_s5 }
  0x20   : > { %p1895_p10 = pnand %p1894_p9, %p1893_p8  ;;  %p1900_p0 = por %p1899_p13, %p1898_p12 }
  0x22   : > { %p1896_p11 = pneg %p1895_p10  ;;  %p1902_p4 = por %p1901_p2, %p1900_p0 }
  0x24   : > { %p1903_p6 = pnand %p1902_p4, %p1896_p11 }
  0x26   : > { %1906 = shalt.err (!%p1903_p6)
}
  0x27   : > { %s1907_s28 = scalar_lea.vmem %s2230_s7, 16384  ;;  %s2104_s29 = smov [#allocation3]  }
  0x28   : > { %p1908_p8 = scmp.ne.s32.totalorder %s2230_s7, %s1907_s28  ;;  %s1912_s30 = sshll.u32 %s2104_s29, 4  ;;  %s1913_s30 = int_to_ptr.vmem [resolvable:$false] %s1912_s30 }
  0x29   : > { %s1914_s25 = scalar_lea.vmem %s1913_s30, 32768  ;;  %p1915_p5 = scmp.lt.s32.totalorder %s2230_s7, %s1913_s30 }
  0x2a   : > { %p1910_p10 = pnand %p1908_p8, %p1894_p9  ;;  %p1916_p12 = scmp.lt.s32.totalorder %s1914_s25, %s1907_s28 }
  0x2c   : > { %p1911_p1 = pneg %p1910_p10  ;;  %p1917_p13 = por %p1916_p12, %p1915_p5 }
  0x2e   : > { %p1918_p0 = pnand %p1917_p13, %p1911_p1 }
  0x30   : > { %1921 = shalt.err (!%p1918_p0)
}
  0x31   : > { %s2811_s3 = smov 512   ;;  %s2812_s4 = smov 32  }
  0x32   : > { %1765 = dma.hbm_to_vmem [thread:$0]  (!%p2226_p7), %s2222_s5, 16384, %s2230_s7, %s2232_s15, %s2811_s3, %s2811_s3, %s2812_s4  }
  0x33   : > { %p1548_p1 = scmp.ge.s32.totalorder %s2102_s22, 1  ;;  %p188_p5 = scmp.lt.s32.totalorder %s2102_s22, 9 }
  0x34   : > { %p2267_p6 = scmp.eq.s32.totalorder %s1536_s23, 7  ;;  %s1537_s8 = sadd.s32 4294967294, %s2102_s22  }
  0x35   : > { %p2271_p9 = pnand %p1548_p1, %p188_p5  ;;  %s36_s29 = sadd.s32 1, %s2094_s20 }
  0x36   : > { %p38_p7 = scmp.ge.s32.totalorder %s36_s29, 4  ;;  %s77_s5 = sadd.s32 1, %s2070_s14 }
  0x37   : > { %p84_p11 = scmp.ne.s32.totalorder %s2070_s14, %s2066_s13  ;;  %p90_p2 = scmp.ne.s32.totalorder %s2066_s13, %s2062_s12 }
  0x38   : > { %s2858_s29 = smov (%p38_p7, %s36_s29), 0  ;;  %s2860_s24 = smov (!%p38_p7, %s40_s24), %s2098_s21 }
  0x39   : > { %2828 = sst [smem:[#allocation14_spill]] %s2858_s29  ;;  %s72_s23 = ssub.s32 %s2094_s20, %s2858_s29 }
  0x3a   : > { %s105_s7 = sadd.s32 1, %s2058_s11  ;;  %p42_p4 = scmp.ge.s32.totalorder %s2860_s24, 2 }
  0x3b   : > { %p75_p8 = scmp.eq.s32.totalorder %s72_s23, 0  ;;  %p2292_p10 = por %p90_p2, %p2204_p3 }
  0x3c   : > { %p115_p12 = scmp.ne.s32.totalorder %s2058_s11, %s2054_s10  ;;  %s2862_s24 = smov (%p42_p4, %s2860_s24), 0 }
  0x3d   : > { %s2829_s12 = scalar_select %p2292_p10, 1, 0 }
  0x3e   : > { %2830 = sst [smem:[#allocation15_spill]] %s2862_s24  ;;  %s44_s30 = ssub.s32 %s2098_s21, %s2862_s24 }
  0x3f   : > { %s2301_s15 = scalar_select %p75_p8, %s2070_s14, %s77_s5  }
  0x40   : > { %p2307_p13 = por %p2267_p6, %p115_p12  ;;  %p47_p0 = scmp.eq.s32.totalorder %s44_s30, 0 }
  0x41   : > { %s102_s26 = sor.u32 %s72_s23, %s44_s30  ;;  %p121_p1 = scmp.ne.s32.totalorder %s2054_s10, %s2050_s9 }
  0x42   : > { %s2831_s25 = scalar_select %p2307_p13, 1, 0 }
  0x43   : > { %p103_p3 = scmp.eq.s32.totalorder %s102_s26, 0  ;;  %s2832_s3 = sadd.s32 1, %s2082_s17 }
  0x44   : > { %s2316_s4 = scalar_select %p47_p0, %s2082_s17, %s2832_s3  }
  0x45   : > { %s2319_s0 = scalar_select %p103_p3, %s2058_s11, %s105_s7  }
  0x46   : > { %p122_p5 = scmp.eq.s32.totalorder %s1537_s8, 7  ;;  %s166_s29 = sand.u32 1, %s2070_s14  }
  0x47   : > { %p2833_p7 = scmp.eq.s32.totalorder %s2102_s22, 0  ;;  %s1544_s6 = sshll.u32 %s166_s29, 10 }
  0x48   : > { %p2327_p6 = por %p122_p5, %p121_p1  ;;  %s1562_s24 = sshll.u32 %s2094_s20, 14 }
  0x49   : > { %p86_p2 = por %p84_p11, %p2833_p7  ;;  %s170_s21 = scalar_lea.vmem [#allocation6], %s1544_s6 }
  0x4a   : > { %s2834_s5 = scalar_select %p2327_p6, 1, 0 }
  0x4b   : > { %s180_s23 = sshll.u32 %s170_s21, 4  ;;  %s2335_s3 = scalar_lea.hbm %s2806_s1, %s1562_s24  ;;  %s2337_s23 = int_to_ptr.vmem [resolvable:$true] %s180_s23 }
  0x4c   : > { %p2835_p11 = scmp.lt.s32.totalorder %s2102_s22, 8  ;;  %s2345_s7 = scalar_lea.sflag [#allocation7], %s166_s29 }
  0x4d   : > { %s1922_s21 = scalar_lea.hbm %s2335_s3, 16384  ;;  %s1927_s30 = scalar_lea.hbm %s2806_s1, 65536 }
  0x4e   : > { %p2341_p4 = pnand %p2835_p11, %p86_p2  ;;  %p1923_p8 = scmp.ne.s32.totalorder %s2335_s3, %s1922_s21 }
  0x4f   : > { %p1928_p1 = scmp.lt.u32.totalorder %s2335_s3, %s2806_s1  ;;  %p1929_p5 = scmp.lt.u32.totalorder %s1927_s30, %s1922_s21 }
  0x50   : > { %p1924_p12 = pneg %p2341_p4  ;;  %p1931_p2 = scmp.lt.u32.totalorder %s1922_s21, %s2335_s3 }
  0x51   : > { %p1930_p7 = por %p1929_p5, %p1928_p1 }
  0x52   : > { %p1925_p0 = pnand %p1924_p12, %p1923_p8 }
  0x53   : > { %p1932_p11 = por %p1931_p2, %p1930_p7 }
  0x54   : > { %p1926_p3 = pneg %p1925_p0 }
  0x56   : > { %p1933_p6 = pnand %p1932_p11, %p1926_p3 }
  0x58   : > { %1936 = shalt.err (!%p1933_p6)
}
  0x59   : > { %s1937_s29 = scalar_lea.vmem %s2337_s23, 16384  ;;  %s2107_s24 = smov [#allocation6]  }
  0x5a   : > { %p1938_p8 = scmp.ne.s32.totalorder %s2337_s23, %s1937_s29  ;;  %s1942_s6 = sshll.u32 %s2107_s24, 4  ;;  %s1943_s6 = int_to_ptr.vmem [resolvable:$false] %s1942_s6 }
  0x5b   : > { %s1944_s20 = scalar_lea.vmem %s1943_s6, 32768  ;;  %p1945_p10 = scmp.lt.s32.totalorder %s2337_s23, %s1943_s6 }
  0x5c   : > { %p1940_p0 = pnand %p1938_p8, %p1924_p12  ;;  %p1946_p1 = scmp.lt.s32.totalorder %s1944_s20, %s1937_s29 }
  0x5e   : > { %p1941_p13 = pneg %p1940_p0  ;;  %p1947_p5 = por %p1946_p1, %p1945_p10 }
  0x60   : > { %p1948_p7 = pnand %p1947_p5, %p1941_p13 }
  0x62   : > { %1951 = shalt.err (!%p1948_p7)
}
  0x63   : > { %s2837_s21 = smov 32   ;;  %s2838_s30 = smov 512  }
  0x64   : > { %1768 = dma.hbm_to_vmem [thread:$0]  (!%p2341_p4), %s2335_s3, 16384, %s2337_s23, %s2345_s7, %s2838_s30, %s2838_s30, %s2837_s21  }
  0x65   : > { %192 = sbr.rel (%p2271_p9) target bundleno = 601 (0x259), region = 28  ;;  %s194_s26 = sand.u32 (!%p2271_p9), 1, %s2078_s16  }
  0x66   : > { %s1549_s24 = sshll.u32 (!%p2271_p9), %s194_s26, 10  ;;  %s195_s29 = scalar_lea.sflag (!%p2271_p9), [#allocation4], %s194_s26 }
  0x67   : > { %s2379_s6 = scalar_lea.vmem (!%p2271_p9), [#allocation3], %s1549_s24  ;;  %p2839_p10 = scmp.ne.s32.totalorder (!%p2271_p9), %s2823_s27, 0 }
  0x6c   : > { %2037 = dma.done.wait (%p2839_p10), %s195_s29, 16384  }
  0x6d   : > { %2039 = vsyncadd (%p2839_p10), %s195_s29, 4294950912  ;;  %s203_s8 = sand.u32 1, %s2066_s13   ;;  %p2840_p9 = scmp.ne.s32.totalorder %s2829_s12, 0 }
  0x6e   : > { %s1550_s20 = sshll.u32 %s203_s8, 10  ;;  %s204_s23 = scalar_lea.sflag [#allocation7], %s203_s8 }
  0x6f   : > { %s2386_s3 = scalar_lea.vmem [#allocation6], %s1550_s20 }
  0x70   : > { %2041 = dma.done.wait (%p2840_p9), %s204_s23, 16384  }
  0x71   : > { %2043 = vsyncadd (%p2840_p9), %s204_s23, 4294950912  ;;  %v500_v0 = vld [vmem:[%s2386_s3 + $0x8] sm:$0xff]  ;;  %v502_v2 = vld [vmem:[%s2386_s3 + $0x18] sm:$0xff]  ;;  %s230_s27 = sand.u32 1, %s2054_s10   ;;  %s1554_s7 = sshll.u32 %s2086_s18, 1 }
  0x72   : > { %v504_v1 = vld [vmem:[%s2386_s3 + $0x28] sm:$0xff]  ;;  %v506_v4 = vld [vmem:[%s2386_s3 + $0x38] sm:$0xff]  ;;  %v499_v5 = vld [vmem:[%s2386_s3] sm:$0xff]  ;;  %s1551_s28 = sshll.u32 %s230_s27, 9  ;;  %s1563_s21 = sshll.u32 %s2090_s19, 8 }
  0x73   : > { %v1564_v3 = vpack.c.bf16 %v504_v1, %v500_v0  ;;  %v503_v6 = vld [vmem:[%s2386_s3 + $0x20] sm:$0xff]  ;;  %v1628_v7 = vpack.c.bf16 %v506_v4, %v502_v2  ;;  %v501_v9 = vld [vmem:[%s2386_s3 + $0x10] sm:$0xff]  ;;  %v508_v11 = vld [vmem:[%s2386_s3 + $0x48] sm:$0xff]  ;;  %s2651_s12 = scalar_lea.vmem [#allocation8], %s1551_s28  ;;  %s1414_s30 = sadd.s32 %s1563_s21, %s1554_s7 }
  0x74   : > { %v1566_v8 = vpack.c.bf16 %v503_v6, %v499_v5  ;;  %v505_v10 = vld [vmem:[%s2386_s3 + $0x30] sm:$0xff]  ;;  %v512_v13 = vld [vmem:[%s2386_s3 + $0x68] sm:$0xff]  ;;  %v510_v14 = vld [vmem:[%s2386_s3 + $0x58] sm:$0xff]  ;;  %s1556_s18 = sshll.u32 %s1414_s30, 7  ;;  %s1417_s19 = sshll.u32 %s2651_s12, 4  ;;  %s2723_s19 = int_to_ptr.vmem [resolvable:$true] %s1417_s19 }
  0x75   : > { %1565 = vmatprep.subr.bf16.mxu1 %v1564_v3  ;;  %v1630_v12 = vpack.c.bf16 %v505_v10, %v501_v9  ;;  %v514_v15 = vld [vmem:[%s2386_s3 + $0x78] sm:$0xff]  ;;  %1629 = vmatprep.subr.bf16.mxu0 %v1628_v7  ;;  %v1568_v16 = vpack.c.bf16 %v512_v13, %v508_v11  ;;  %v507_v18 = vld [vmem:[%s2386_s3 + $0x40] sm:$0xff]  ;;  %v509_v20 = vld [vmem:[%s2386_s3 + $0x50] sm:$0xff]  ;;  %s2721_s29 = scalar_lea.hbm %s2807_s2, %s1556_s18  ;;  %s1952_s8 = scalar_lea.vmem %s2723_s19, 8192 }
  0x76   : > { %1567 = vmatpush1.bf16.xpose.msra.mxu1 %v1566_v8  ;;  %v1632_v17 = vpack.c.bf16 %v514_v15, %v510_v14  ;;  %v511_v19 = vld [vmem:[%s2386_s3 + $0x60] sm:$0xff]  ;;  %v513_v21 = vld [vmem:[%s2386_s3 + $0x70] sm:$0xff]  ;;  %v516_v22 = vld [vmem:[%s2386_s3 + $0x88] sm:$0xff]  ;;  %p1953_p13 = scmp.ne.s32.totalorder %s2723_s19, %s1952_s8  ;;  %p2841_p6 = scmp.ne.s32.totalorder %s2831_s25, 0 }
  0x77   : > { %1631 = vmatpush1.bf16.xpose.msra.mxu0 %v1630_v12  ;;  %1569 = vmatprep.subr.bf16.mxu1 %v1568_v16  ;;  %v520_v23 = vld [vmem:[%s2386_s3 + $0xa8] sm:$0xff]  ;;  %v518_v24 = vld [vmem:[%s2386_s3 + $0x98] sm:$0xff]  ;;  %v1570_v26 = vpack.c.bf16 %v511_v19, %v507_v18  ;;  %v1634_v27 = vpack.c.bf16 %v513_v21, %v509_v20  ;;  %v515_v30 = vld [vmem:[%s2386_s3 + $0x80] sm:$0xff]  ;;  %s2108_s20 = smov [#allocation8]  }
  0x78   : > { %1633 = vmatprep.subr.bf16.mxu0 %v1632_v17  ;;  %v522_v25 = vld [vmem:[%s2386_s3 + $0xb8] sm:$0xff]  ;;  %v1572_v28 = vpack.c.bf16 %v520_v23, %v516_v22  ;;  %v519_v31 = vld [vmem:[%s2386_s3 + $0xa0] sm:$0xff]  ;;  %v517_v32 = vld [vmem:[%s2386_s3 + $0x90] sm:$0xff]  ;;  %p1954_p4 = pnand %p1953_p13, %p2841_p6  ;;  %s1956_s23 = sshll.u32 %s2108_s20, 4  ;;  %s1957_s23 = int_to_ptr.vmem [resolvable:$false] %s1956_s23 }
  0x79   : > { %v1636_v29 = vpack.c.bf16 %v522_v25, %v518_v24  ;;  %v521_v33 = vld [vmem:[%s2386_s3 + $0xb0] sm:$0xff]  ;;  %v524_v34 = vld [vmem:[%s2386_s3 + $0xc8] sm:$0xff]  ;;  %v526_v36 = vld [vmem:[%s2386_s3 + $0xd8] sm:$0xff]  ;;  %v1574_v38 = vpack.c.bf16 %v519_v31, %v515_v30  ;;  %p1959_p3 = scmp.lt.s32.totalorder %s2723_s19, %s1957_s23 }
  0x7a   : > { %v528_v35 = vld [vmem:[%s2386_s3 + $0xe8] sm:$0xff]  ;;  %v530_v37 = vld [vmem:[%s2386_s3 + $0xf8] sm:$0xff]  ;;  %v1638_v39 = vpack.c.bf16 %v521_v33, %v517_v32  ;;  %v523_v42 = vld [vmem:[%s2386_s3 + $0xc0] sm:$0xff]  ;;  %p1955_p12 = pneg %p1954_p4 }
  0x7b   : > { %v1576_v40 = vpack.c.bf16 %v528_v35, %v524_v34  ;;  %v1640_v41 = vpack.c.bf16 %v530_v37, %v526_v36  ;;  %v527_v43 = vld [vmem:[%s2386_s3 + $0xe0] sm:$0xff]  ;;  %v525_v44 = vld [vmem:[%s2386_s3 + $0xd0] sm:$0xff]  ;;  %v532_v46 = vld [vmem:[%s2386_s3 + $0x108] sm:$0xff] }
  0x7c   : > { %v529_v45 = vld [vmem:[%s2386_s3 + $0xf0] sm:$0xff]  ;;  %v536_v47 = vld [vmem:[%s2386_s3 + $0x128] sm:$0xff]  ;;  %v534_v48 = vld [vmem:[%s2386_s3 + $0x118] sm:$0xff]  ;;  %v1578_v50 = vpack.c.bf16 %v527_v43, %v523_v42 }
  0x7d   : > { %v538_v49 = vld [vmem:[%s2386_s3 + $0x138] sm:$0xff]  ;;  %v1642_v51 = vpack.c.bf16 %v529_v45, %v525_v44  ;;  %v1580_v52 = vpack.c.bf16 %v536_v47, %v532_v46  ;;  %v531_v54 = vld [vmem:[%s2386_s3 + $0x100] sm:$0xff]  ;;  %v533_v56 = vld [vmem:[%s2386_s3 + $0x110] sm:$0xff] }
  0x7e   : > { %1571 = vmatpush1.bf16.xpose.msra.mxu1 %v1570_v26  ;;  %v1644_v53 = vpack.c.bf16 %v538_v49, %v534_v48  ;;  %v535_v55 = vld [vmem:[%s2386_s3 + $0x120] sm:$0xff]  ;;  %v537_v57 = vld [vmem:[%s2386_s3 + $0x130] sm:$0xff]  ;;  %v540_v58 = vld [vmem:[%s2386_s3 + $0x148] sm:$0xff] }
  0x7f   : > { %1635 = vmatpush1.bf16.xpose.msra.mxu0 %v1634_v27  ;;  %1573 = vmatprep.subr.bf16.mxu1 %v1572_v28  ;;  %v544_v59 = vld [vmem:[%s2386_s3 + $0x168] sm:$0xff]  ;;  %v542_v60 = vld [vmem:[%s2386_s3 + $0x158] sm:$0xff]  ;;  %v1582_v62 = vpack.c.bf16 %v535_v55, %v531_v54  ;;  %v1646_v63 = vpack.c.bf16 %v537_v57, %v533_v56  ;;  %v539_v2 = vld [vmem:[%s2386_s3 + $0x140] sm:$0xff] }
  0x80   : > { %1637 = vmatprep.subr.bf16.mxu0 %v1636_v29  ;;  %v546_v61 = vld [vmem:[%s2386_s3 + $0x178] sm:$0xff]  ;;  %v1584_v0 = vpack.c.bf16 %v544_v59, %v540_v58  ;;  %v543_v3 = vld [vmem:[%s2386_s3 + $0x160] sm:$0xff]  ;;  %v541_v4 = vld [vmem:[%s2386_s3 + $0x150] sm:$0xff] }
  0x81   : > { %v1648_v1 = vpack.c.bf16 %v546_v61, %v542_v60  ;;  %v545_v5 = vld [vmem:[%s2386_s3 + $0x170] sm:$0xff]  ;;  %v548_v6 = vld [vmem:[%s2386_s3 + $0x188] sm:$0xff]  ;;  %v550_v8 = vld [vmem:[%s2386_s3 + $0x198] sm:$0xff]  ;;  %v1586_v10 = vpack.c.bf16 %v543_v3, %v539_v2 }
  0x82   : > { %v552_v7 = vld [vmem:[%s2386_s3 + $0x1a8] sm:$0xff]  ;;  %v554_v9 = vld [vmem:[%s2386_s3 + $0x1b8] sm:$0xff]  ;;  %v1650_v11 = vpack.c.bf16 %v545_v5, %v541_v4  ;;  %v547_v16 = vld [vmem:[%s2386_s3 + $0x180] sm:$0xff] }
  0x83   : > { %v1588_v12 = vpack.c.bf16 %v552_v7, %v548_v6  ;;  %v1652_v13 = vpack.c.bf16 %v554_v9, %v550_v8  ;;  %v372_v14 = vld [vmem:[%s2379_s6 + $0x8] sm:$0xff]  ;;  %v374_v15 = vld [vmem:[%s2379_s6 + $0x18] sm:$0xff]  ;;  %v551_v17 = vld [vmem:[%s2386_s3 + $0x1a0] sm:$0xff] }
  0x84   : > { %691 = vmatprep.mubr.f32.mxu1 %v372_v14  ;;  %948 = vmatprep.mubr.f32.mxu0 %v374_v15  ;;  %v549_v18 = vld [vmem:[%s2386_s3 + $0x190] sm:$0xff]  ;;  %v556_v20 = vld [vmem:[%s2386_s3 + $0x1c8] sm:$0xff]  ;;  %v558_v22 = vld [vmem:[%s2386_s3 + $0x1d8] sm:$0xff]  ;;  %v1590_v24 = vpack.c.bf16 %v551_v17, %v547_v16 }
  0x85   : > { %v553_v19 = vld [vmem:[%s2386_s3 + $0x1b0] sm:$0xff]  ;;  %v560_v21 = vld [vmem:[%s2386_s3 + $0x1e8] sm:$0xff]  ;;  %v562_v23 = vld [vmem:[%s2386_s3 + $0x1f8] sm:$0xff] }
  0x86   : > { %1575 = vmatpush1.bf16.xpose.msra.mxu1 %v1574_v38  ;;  %v1654_v25 = vpack.c.bf16 %v553_v19, %v549_v18  ;;  %v1592_v26 = vpack.c.bf16 %v560_v21, %v556_v20  ;;  %v1656_v27 = vpack.c.bf16 %v562_v23, %v558_v22  ;;  %v555_v28 = vld [vmem:[%s2386_s3 + $0x1c0] sm:$0xff]  ;;  %v557_v30 = vld [vmem:[%s2386_s3 + $0x1d0] sm:$0xff]  ;;  %v564_v32 = vld [vmem:[%s2386_s3 + $0x208] sm:$0xff] }
  0x87   : > { %1639 = vmatpush1.bf16.xpose.msra.mxu0 %v1638_v39  ;;  %1577 = vmatprep.subr.bf16.mxu1 %v1576_v40  ;;  %v559_v29 = vld [vmem:[%s2386_s3 + $0x1e0] sm:$0xff]  ;;  %v561_v31 = vld [vmem:[%s2386_s3 + $0x1f0] sm:$0xff]  ;;  %v568_v33 = vld [vmem:[%s2386_s3 + $0x228] sm:$0xff] }
  0x88   : > { %1641 = vmatprep.subr.bf16.mxu0 %v1640_v41  ;;  %v566_v34 = vld [vmem:[%s2386_s3 + $0x218] sm:$0xff]  ;;  %v1594_v36 = vpack.c.bf16 %v559_v29, %v555_v28  ;;  %v1658_v37 = vpack.c.bf16 %v561_v31, %v557_v30  ;;  %v1596_v38 = vpack.c.bf16 %v568_v33, %v564_v32  ;;  %v563_v40 = vld [vmem:[%s2386_s3 + $0x200] sm:$0xff]  ;;  %v565_v42 = vld [vmem:[%s2386_s3 + $0x210] sm:$0xff] }
  0x89   : > { %v570_v35 = vld [vmem:[%s2386_s3 + $0x238] sm:$0xff]  ;;  %v567_v41 = vld [vmem:[%s2386_s3 + $0x220] sm:$0xff]  ;;  %v569_v43 = vld [vmem:[%s2386_s3 + $0x230] sm:$0xff] }
  0x8a   : > { %v1660_v39 = vpack.c.bf16 %v570_v35, %v566_v34  ;;  %v572_v44 = vld [vmem:[%s2386_s3 + $0x248] sm:$0xff]  ;;  %v574_v46 = vld [vmem:[%s2386_s3 + $0x258] sm:$0xff]  ;;  %v1598_v48 = vpack.c.bf16 %v567_v41, %v563_v40  ;;  %v1662_v49 = vpack.c.bf16 %v569_v43, %v565_v42  ;;  %v573_v54 = vld [vmem:[%s2386_s3 + $0x250] sm:$0xff] }
  0x8b   : > { %v576_v45 = vld [vmem:[%s2386_s3 + $0x268] sm:$0xff]  ;;  %v578_v47 = vld [vmem:[%s2386_s3 + $0x278] sm:$0xff]  ;;  %v577_v55 = vld [vmem:[%s2386_s3 + $0x270] sm:$0xff] }
  0x8c   : > { %v580_v56 = vld [vmem:[%s2386_s3 + $0x288] sm:$0xff]  ;;  %v582_v58 = vld [vmem:[%s2386_s3 + $0x298] sm:$0xff]  ;;  %v1666_v61 = vpack.c.bf16 %v577_v55, %v573_v54  ;;  %v581_v2 = vld [vmem:[%s2386_s3 + $0x290] sm:$0xff] }
  0x8d   : > { %v584_v57 = vld [vmem:[%s2386_s3 + $0x2a8] sm:$0xff]  ;;  %v586_v59 = vld [vmem:[%s2386_s3 + $0x2b8] sm:$0xff]  ;;  %v585_v3 = vld [vmem:[%s2386_s3 + $0x2b0] sm:$0xff] }
  0x8e   : > { %1579 = vmatpush1.bf16.xpose.msra.mxu1 %v1578_v50  ;;  %v1600_v50 = vpack.c.bf16 %v576_v45, %v572_v44  ;;  %v588_v4 = vld [vmem:[%s2386_s3 + $0x2c8] sm:$0xff]  ;;  %v590_v6 = vld [vmem:[%s2386_s3 + $0x2d8] sm:$0xff]  ;;  %v1670_v9 = vpack.c.bf16 %v585_v3, %v581_v2  ;;  %v589_v14 = vld [vmem:[%s2386_s3 + $0x2d0] sm:$0xff] }
  0x8f   : > { %1643 = vmatpush1.bf16.xpose.msra.mxu0 %v1642_v51  ;;  %1581 = vmatprep.subr.bf16.mxu1 %v1580_v52  ;;  %v1664_v51 = vpack.c.bf16 %v578_v47, %v574_v46  ;;  %v571_v52 = vld [vmem:[%s2386_s3 + $0x240] sm:$0xff]  ;;  %v592_v5 = vld [vmem:[%s2386_s3 + $0x2e8] sm:$0xff]  ;;  %v594_v7 = vld [vmem:[%s2386_s3 + $0x2f8] sm:$0xff] }
  0x90   : > { %1645 = vmatprep.subr.bf16.mxu0 %v1644_v53  ;;  %v575_v53 = vld [vmem:[%s2386_s3 + $0x260] sm:$0xff]  ;;  %v593_v15 = vld [vmem:[%s2386_s3 + $0x2f0] sm:$0xff]  ;;  %v596_v16 = vld [vmem:[%s2386_s3 + $0x308] sm:$0xff] }
  0x91   : > { %v1602_v60 = vpack.c.bf16 %v575_v53, %v571_v52  ;;  %v600_v17 = vld [vmem:[%s2386_s3 + $0x328] sm:$0xff]  ;;  %v598_v18 = vld [vmem:[%s2386_s3 + $0x318] sm:$0xff]  ;;  %v1674_v21 = vpack.c.bf16 %v593_v15, %v589_v14  ;;  %v371_v2 = vld [vmem:[%s2379_s6] sm:$0xff] }
  0x92   : > { %v602_v19 = vld [vmem:[%s2386_s3 + $0x338] sm:$0xff]  ;;  %v1612_v22 = vpack.c.bf16 %v600_v17, %v596_v16  ;;  %v604_v28 = vld [vmem:[%s2386_s3 + $0x348] sm:$0xff]  ;;  %v373_v3 = vld [vmem:[%s2379_s6 + $0x10] sm:$0xff] }
  0x93   : > { %v1676_v23 = vpack.c.bf16 %v602_v19, %v598_v18  ;;  %v608_v29 = vld [vmem:[%s2386_s3 + $0x368] sm:$0xff]  ;;  %v606_v30 = vld [vmem:[%s2386_s3 + $0x358] sm:$0xff]  ;;  %v383_v14 = vld [vmem:[%s2379_s6 + $0x60] sm:$0xff] }
  0x94   : > { %v610_v31 = vld [vmem:[%s2386_s3 + $0x378] sm:$0xff]  ;;  %v1616_v34 = vpack.c.bf16 %v608_v29, %v604_v28  ;;  %v612_v40 = vld [vmem:[%s2386_s3 + $0x388] sm:$0xff]  ;;  %v385_v15 = vld [vmem:[%s2379_s6 + $0x70] sm:$0xff] }
  0x95   : > { %v1680_v35 = vpack.c.bf16 %v610_v31, %v606_v30  ;;  %v616_v41 = vld [vmem:[%s2386_s3 + $0x3a8] sm:$0xff]  ;;  %v614_v42 = vld [vmem:[%s2386_s3 + $0x398] sm:$0xff]  ;;  %v387_v18 = vld [vmem:[%s2379_s6 + $0x80] sm:$0xff] }
  0x96   : > { %1583 = vmatpush1.bf16.xpose.msra.mxu1 %v1582_v62  ;;  %v1604_v62 = vpack.c.bf16 %v584_v57, %v580_v56  ;;  %v618_v43 = vld [vmem:[%s2386_s3 + $0x3b8] sm:$0xff]  ;;  %v1620_v46 = vpack.c.bf16 %v616_v41, %v612_v40  ;;  %v620_v52 = vld [vmem:[%s2386_s3 + $0x3c8] sm:$0xff]  ;;  %v389_v19 = vld [vmem:[%s2379_s6 + $0x90] sm:$0xff] }
  0x97   : > { %1647 = vmatpush1.bf16.xpose.msra.mxu0 %v1646_v63  ;;  %1585 = vmatprep.subr.bf16.mxu1 %v1584_v0  ;;  %v1668_v63 = vpack.c.bf16 %v586_v59, %v582_v58  ;;  %v579_v0 = vld [vmem:[%s2386_s3 + $0x280] sm:$0xff]  ;;  %v1684_v47 = vpack.c.bf16 %v618_v43, %v614_v42  ;;  %v624_v53 = vld [vmem:[%s2386_s3 + $0x3e8] sm:$0xff]  ;;  %v622_v54 = vld [vmem:[%s2386_s3 + $0x3d8] sm:$0xff] }
  0x98   : > { %1649 = vmatprep.subr.bf16.mxu0 %v1648_v1  ;;  %v583_v1 = vld [vmem:[%s2386_s3 + $0x2a0] sm:$0xff]  ;;  %v626_v55 = vld [vmem:[%s2386_s3 + $0x3f8] sm:$0xff]  ;;  %v1624_v58 = vpack.c.bf16 %v624_v53, %v620_v52  ;;  %v388_v16 = vld [vmem:[%s2379_s6 + $0x88] sm:$0xff] }
  0x99   : > { %v1606_v8 = vpack.c.bf16 %v583_v1, %v579_v0  ;;  %v1688_v59 = vpack.c.bf16 %v626_v55, %v622_v54  ;;  %v390_v17 = vld [vmem:[%s2379_s6 + $0x98] sm:$0xff]  ;;  %v400_v28 = vld [vmem:[%s2379_s6 + $0xe8] sm:$0xff]  ;;  %v399_v30 = vld [vmem:[%s2379_s6 + $0xe0] sm:$0xff] }
  0x9a   : > { %v402_v29 = vld [vmem:[%s2379_s6 + $0xf8] sm:$0xff]  ;;  %v401_v31 = vld [vmem:[%s2379_s6 + $0xf0] sm:$0xff]  ;;  %v412_v40 = vld [vmem:[%s2379_s6 + $0x148] sm:$0xff] }
  0x9b   : > { %v414_v41 = vld [vmem:[%s2379_s6 + $0x158] sm:$0xff]  ;;  %v411_v42 = vld [vmem:[%s2379_s6 + $0x140] sm:$0xff]  ;;  %v413_v43 = vld [vmem:[%s2379_s6 + $0x150] sm:$0xff] }
  0x9c   : > { %v424_v52 = vld [vmem:[%s2379_s6 + $0x1a8] sm:$0xff]  ;;  %v426_v53 = vld [vmem:[%s2379_s6 + $0x1b8] sm:$0xff]  ;;  %v423_v54 = vld [vmem:[%s2379_s6 + $0x1a0] sm:$0xff] }
  0x9d   : > { %v425_v55 = vld [vmem:[%s2379_s6 + $0x1b0] sm:$0xff] }
  0x9e   : > { %1587 = vmatpush1.bf16.xpose.msra.mxu1 %v1586_v10  ;;  %v1608_v10 = vpack.c.bf16 %v592_v5, %v588_v4  ;;  %v376_v4 = vld [vmem:[%s2379_s6 + $0x28] sm:$0xff]  ;;  %v378_v5 = vld [vmem:[%s2379_s6 + $0x38] sm:$0xff] }
  0x9f   : > { %1651 = vmatpush1.bf16.xpose.msra.mxu0 %v1650_v11  ;;  %1589 = vmatprep.subr.bf16.mxu1 %v1588_v12  ;;  %v1672_v11 = vpack.c.bf16 %v594_v7, %v590_v6  ;;  %v587_v12 = vld [vmem:[%s2386_s3 + $0x2c0] sm:$0xff]  ;;  %v377_v7 = vld [vmem:[%s2379_s6 + $0x30] sm:$0xff] }
  0xa0   : > { %1653 = vmatprep.subr.bf16.mxu0 %v1652_v13  ;;  %v591_v13 = vld [vmem:[%s2386_s3 + $0x2e0] sm:$0xff] }
  0xa1   : > { %v1610_v20 = vpack.c.bf16 %v591_v13, %v587_v12  ;;  %v375_v6 = vld [vmem:[%s2379_s6 + $0x20] sm:$0xff]  ;;  %v384_v12 = vld [vmem:[%s2379_s6 + $0x68] sm:$0xff]  ;;  %v386_v13 = vld [vmem:[%s2379_s6 + $0x78] sm:$0xff] }
  0xa6   : > { %1591 = vmatpush1.bf16.xpose.msra.mxu1 %v1590_v24  ;;  %v595_v24 = vld [vmem:[%s2386_s3 + $0x300] sm:$0xff] }
  0xa7   : > { %1655 = vmatpush1.bf16.xpose.msra.mxu0 %v1654_v25  ;;  %1593 = vmatprep.subr.bf16.mxu1 %v1592_v26  ;;  %v599_v25 = vld [vmem:[%s2386_s3 + $0x320] sm:$0xff]  ;;  %v597_v26 = vld [vmem:[%s2386_s3 + $0x310] sm:$0xff] }
  0xa8   : > { %1657 = vmatprep.subr.bf16.mxu0 %v1656_v27  ;;  %v601_v27 = vld [vmem:[%s2386_s3 + $0x330] sm:$0xff]  ;;  %v1614_v32 = vpack.c.bf16 %v599_v25, %v595_v24  ;;  %v396_v24 = vld [vmem:[%s2379_s6 + $0xc8] sm:$0xff]  ;;  %v398_v25 = vld [vmem:[%s2379_s6 + $0xd8] sm:$0xff] }
  0xa9   : > { %v1678_v33 = vpack.c.bf16 %v601_v27, %v597_v26  ;;  %v395_v26 = vld [vmem:[%s2379_s6 + $0xc0] sm:$0xff]  ;;  %v397_v27 = vld [vmem:[%s2379_s6 + $0xd0] sm:$0xff] }
  0xae   : > { %1595 = vmatpush1.bf16.xpose.msra.mxu1 %v1594_v36  ;;  %v603_v36 = vld [vmem:[%s2386_s3 + $0x340] sm:$0xff] }
  0xaf   : > { %1659 = vmatpush1.bf16.xpose.msra.mxu0 %v1658_v37  ;;  %1597 = vmatprep.subr.bf16.mxu1 %v1596_v38  ;;  %v607_v37 = vld [vmem:[%s2386_s3 + $0x360] sm:$0xff]  ;;  %v605_v38 = vld [vmem:[%s2386_s3 + $0x350] sm:$0xff] }
  0xb0   : > { %1661 = vmatprep.subr.bf16.mxu0 %v1660_v39  ;;  %v609_v39 = vld [vmem:[%s2386_s3 + $0x370] sm:$0xff]  ;;  %v1618_v44 = vpack.c.bf16 %v607_v37, %v603_v36  ;;  %v408_v36 = vld [vmem:[%s2379_s6 + $0x128] sm:$0xff]  ;;  %v410_v37 = vld [vmem:[%s2379_s6 + $0x138] sm:$0xff] }
  0xb1   : > { %v1682_v45 = vpack.c.bf16 %v609_v39, %v605_v38  ;;  %v407_v38 = vld [vmem:[%s2379_s6 + $0x120] sm:$0xff]  ;;  %v409_v39 = vld [vmem:[%s2379_s6 + $0x130] sm:$0xff] }
  0xb6   : > { %1599 = vmatpush1.bf16.xpose.msra.mxu1 %v1598_v48  ;;  %v611_v48 = vld [vmem:[%s2386_s3 + $0x380] sm:$0xff] }
  0xb7   : > { %1663 = vmatpush1.bf16.xpose.msra.mxu0 %v1662_v49  ;;  %1601 = vmatprep.subr.bf16.mxu1 %v1600_v50  ;;  %v615_v49 = vld [vmem:[%s2386_s3 + $0x3a0] sm:$0xff]  ;;  %v613_v50 = vld [vmem:[%s2386_s3 + $0x390] sm:$0xff] }
  0xb8   : > { %1665 = vmatprep.subr.bf16.mxu0 %v1664_v51  ;;  %v617_v51 = vld [vmem:[%s2386_s3 + $0x3b0] sm:$0xff]  ;;  %v1622_v56 = vpack.c.bf16 %v615_v49, %v611_v48  ;;  %v420_v48 = vld [vmem:[%s2379_s6 + $0x188] sm:$0xff]  ;;  %v422_v49 = vld [vmem:[%s2379_s6 + $0x198] sm:$0xff] }
  0xb9   : > { %v1686_v57 = vpack.c.bf16 %v617_v51, %v613_v50  ;;  %v419_v50 = vld [vmem:[%s2379_s6 + $0x180] sm:$0xff]  ;;  %v421_v51 = vld [vmem:[%s2379_s6 + $0x190] sm:$0xff] }
  0xbe   : > { %1603 = vmatpush1.bf16.xpose.msra.mxu1 %v1602_v60  ;;  %v619_v60 = vld [vmem:[%s2386_s3 + $0x3c0] sm:$0xff] }
  0xbf   : > { %1667 = vmatpush1.bf16.xpose.msra.mxu0 %v1666_v61  ;;  %1605 = vmatprep.subr.bf16.mxu1 %v1604_v62  ;;  %v623_v61 = vld [vmem:[%s2386_s3 + $0x3e0] sm:$0xff]  ;;  %v621_v62 = vld [vmem:[%s2386_s3 + $0x3d0] sm:$0xff] }
  0xc0   : > { %1669 = vmatprep.subr.bf16.mxu0 %v1668_v63  ;;  %v625_v63 = vld [vmem:[%s2386_s3 + $0x3f0] sm:$0xff]  ;;  %v1626_v0 = vpack.c.bf16 %v623_v61, %v619_v60  ;;  %v432_v60 = vld [vmem:[%s2379_s6 + $0x1e8] sm:$0xff]  ;;  %v434_v61 = vld [vmem:[%s2379_s6 + $0x1f8] sm:$0xff]  ;;  %s1958_s3 = scalar_lea.vmem %s1957_s23, 16384 }
  0xc1   : > { %v1690_v1 = vpack.c.bf16 %v625_v63, %v621_v62  ;;  %v431_v62 = vld [vmem:[%s2379_s6 + $0x1e0] sm:$0xff]  ;;  %v433_v63 = vld [vmem:[%s2379_s6 + $0x1f0] sm:$0xff]  ;;  %p1960_p2 = scmp.lt.s32.totalorder %s1958_s3, %s1952_s8 }
  0xc3   : > { %p1961_p11 = por %p1960_p2, %p1959_p3 }
  0xc5   : > { %p1962_p8 = pnand %p1961_p11, %p1955_p12 }
  0xc6   : > { %1607 = vmatpush1.bf16.xpose.msra.mxu1 %v1606_v8  ;;  %v380_v8 = vld [vmem:[%s2379_s6 + $0x48] sm:$0xff] }
  0xc7   : > { %1671 = vmatpush1.bf16.xpose.msra.mxu0 %v1670_v9  ;;  %1609 = vmatprep.subr.bf16.mxu1 %v1608_v10  ;;  %v382_v9 = vld [vmem:[%s2379_s6 + $0x58] sm:$0xff]  ;;  %v379_v10 = vld [vmem:[%s2379_s6 + $0x40] sm:$0xff] }
  0xc8   : > { %1673 = vmatprep.subr.bf16.mxu0 %v1672_v11  ;;  %v381_v11 = vld [vmem:[%s2379_s6 + $0x50] sm:$0xff] }
  0xce   : > { %1611 = vmatpush1.bf16.xpose.msra.mxu1 %v1610_v20  ;;  %v392_v20 = vld [vmem:[%s2379_s6 + $0xa8] sm:$0xff] }
  0xcf   : > { %1675 = vmatpush1.bf16.xpose.msra.mxu0 %v1674_v21  ;;  %1613 = vmatprep.subr.bf16.mxu1 %v1612_v22  ;;  %v394_v21 = vld [vmem:[%s2379_s6 + $0xb8] sm:$0xff]  ;;  %v391_v22 = vld [vmem:[%s2379_s6 + $0xa0] sm:$0xff] }
  0xd0   : > { %1677 = vmatprep.subr.bf16.mxu0 %v1676_v23  ;;  %v393_v23 = vld [vmem:[%s2379_s6 + $0xb0] sm:$0xff] }
  0xd6   : > { %1615 = vmatpush1.bf16.xpose.msra.mxu1 %v1614_v32  ;;  %v404_v32 = vld [vmem:[%s2379_s6 + $0x108] sm:$0xff] }
  0xd7   : > { %1679 = vmatpush1.bf16.xpose.msra.mxu0 %v1678_v33  ;;  %1617 = vmatprep.subr.bf16.mxu1 %v1616_v34  ;;  %v406_v33 = vld [vmem:[%s2379_s6 + $0x118] sm:$0xff]  ;;  %v403_v34 = vld [vmem:[%s2379_s6 + $0x100] sm:$0xff] }
  0xd8   : > { %1681 = vmatprep.subr.bf16.mxu0 %v1680_v35  ;;  %v405_v35 = vld [vmem:[%s2379_s6 + $0x110] sm:$0xff] }
  0xde   : > { %1619 = vmatpush1.bf16.xpose.msra.mxu1 %v1618_v44  ;;  %v416_v44 = vld [vmem:[%s2379_s6 + $0x168] sm:$0xff] }
  0xdf   : > { %1683 = vmatpush1.bf16.xpose.msra.mxu0 %v1682_v45  ;;  %1621 = vmatprep.subr.bf16.mxu1 %v1620_v46  ;;  %v418_v45 = vld [vmem:[%s2379_s6 + $0x178] sm:$0xff]  ;;  %v415_v46 = vld [vmem:[%s2379_s6 + $0x160] sm:$0xff] }
  0xe0   : > { %1685 = vmatprep.subr.bf16.mxu0 %v1684_v47  ;;  %v417_v47 = vld [vmem:[%s2379_s6 + $0x170] sm:$0xff] }
  0xe6   : > { %1623 = vmatpush1.bf16.xpose.msra.mxu1 %v1622_v56  ;;  %v428_v56 = vld [vmem:[%s2379_s6 + $0x1c8] sm:$0xff] }
  0xe7   : > { %1687 = vmatpush1.bf16.xpose.msra.mxu0 %v1686_v57  ;;  %1625 = vmatprep.subr.bf16.mxu1 %v1624_v58  ;;  %v430_v57 = vld [vmem:[%s2379_s6 + $0x1d8] sm:$0xff]  ;;  %v427_v58 = vld [vmem:[%s2379_s6 + $0x1c0] sm:$0xff] }
  0xe8   : > { %1689 = vmatprep.subr.bf16.mxu0 %v1688_v59  ;;  %v429_v59 = vld [vmem:[%s2379_s6 + $0x1d0] sm:$0xff] }
  0xee   : > { %1627 = vmatpush1.bf16.xpose.msra.mxu1 %v1626_v0  ;;  %v436_v0 = vld [vmem:[%s2379_s6 + $0x208] sm:$0xff] }
  0xef   : > { %1691 = vmatpush1.bf16.xpose.msra.mxu0 %v1690_v1  ;;  %v438_v1 = vld [vmem:[%s2379_s6 + $0x218] sm:$0xff] }
  0xf5   : > { %692 = vmatmul.mubr.f32.vlgmr.msra.gmra.mrb[0].mxu1 %v371_v2  ;;  %v435_v2 = vld [vmem:[%s2379_s6 + $0x200] sm:$0xff] }
  0xf6   : > { %949 = vmatmul.mubr.f32.vlgmr.msra.gmra.mrb[0].mxu0 %v373_v3  ;;  %697 = vmatprep.mubr.f32.mxu1 %v376_v4  ;;  %v437_v3 = vld [vmem:[%s2379_s6 + $0x210] sm:$0xff]  ;;  %v440_v4 = vld [vmem:[%s2379_s6 + $0x228] sm:$0xff] }
  0xf7   : > { %954 = vmatprep.mubr.f32.mxu0 %v378_v5  ;;  %v442_v5 = vld [vmem:[%s2379_s6 + $0x238] sm:$0xff] }
  0xf9   : > { %698 = vmatmul.mubr.f32.gmra.mrb[2].mxu1 %v375_v6  ;;  %v439_v6 = vld [vmem:[%s2379_s6 + $0x220] sm:$0xff] }
  0xfa   : > { %955 = vmatmul.mubr.f32.gmra.mrb[2].mxu0 %v377_v7  ;;  %703 = vmatprep.mubr.f32.mxu1 %v380_v8  ;;  %v441_v7 = vld [vmem:[%s2379_s6 + $0x230] sm:$0xff]  ;;  %v444_v8 = vld [vmem:[%s2379_s6 + $0x248] sm:$0xff] }
  0xfb   : > { %960 = vmatprep.mubr.f32.mxu0 %v382_v9  ;;  %v446_v9 = vld [vmem:[%s2379_s6 + $0x258] sm:$0xff] }
  0xfd   : > { %704 = vmatmul.mubr.f32.gmra.mrb[4].mxu1 %v379_v10  ;;  %v443_v10 = vld [vmem:[%s2379_s6 + $0x240] sm:$0xff] }
  0xfe   : > { %961 = vmatmul.mubr.f32.gmra.mrb[4].mxu0 %v381_v11  ;;  %709 = vmatprep.mubr.f32.mxu1 %v384_v12  ;;  %v445_v11 = vld [vmem:[%s2379_s6 + $0x250] sm:$0xff]  ;;  %v448_v12 = vld [vmem:[%s2379_s6 + $0x268] sm:$0xff] }
  0xff   : > { %966 = vmatprep.mubr.f32.mxu0 %v386_v13  ;;  %v450_v13 = vld [vmem:[%s2379_s6 + $0x278] sm:$0xff] }
 0x101   : > { %710 = vmatmul.mubr.f32.gmra.mrb[6].mxu1 %v383_v14  ;;  %v447_v14 = vld [vmem:[%s2379_s6 + $0x260] sm:$0xff] }
 0x102   : > { %967 = vmatmul.mubr.f32.gmra.mrb[6].mxu0 %v385_v15  ;;  %715 = vmatprep.mubr.f32.mxu1 %v388_v16  ;;  %v449_v15 = vld [vmem:[%s2379_s6 + $0x270] sm:$0xff]  ;;  %v452_v16 = vld [vmem:[%s2379_s6 + $0x288] sm:$0xff] }
 0x103   : > { %972 = vmatprep.mubr.f32.mxu0 %v390_v17  ;;  %v454_v17 = vld [vmem:[%s2379_s6 + $0x298] sm:$0xff] }
 0x105   : > { %716 = vmatmul.mubr.f32.gmra.mrb[8].mxu1 %v387_v18  ;;  %v451_v18 = vld [vmem:[%s2379_s6 + $0x280] sm:$0xff] }
 0x106   : > { %973 = vmatmul.mubr.f32.gmra.mrb[8].mxu0 %v389_v19  ;;  %721 = vmatprep.mubr.f32.mxu1 %v392_v20  ;;  %v453_v19 = vld [vmem:[%s2379_s6 + $0x290] sm:$0xff]  ;;  %v456_v20 = vld [vmem:[%s2379_s6 + $0x2a8] sm:$0xff] }
 0x107   : > { %978 = vmatprep.mubr.f32.mxu0 %v394_v21  ;;  %v458_v21 = vld [vmem:[%s2379_s6 + $0x2b8] sm:$0xff] }
 0x109   : > { %722 = vmatmul.mubr.f32.gmra.mrb[10].mxu1 %v391_v22  ;;  %v455_v22 = vld [vmem:[%s2379_s6 + $0x2a0] sm:$0xff] }
 0x10a   : > { %979 = vmatmul.mubr.f32.gmra.mrb[10].mxu0 %v393_v23  ;;  %727 = vmatprep.mubr.f32.mxu1 %v396_v24  ;;  %v457_v23 = vld [vmem:[%s2379_s6 + $0x2b0] sm:$0xff]  ;;  %v460_v24 = vld [vmem:[%s2379_s6 + $0x2c8] sm:$0xff] }
 0x10b   : > { %984 = vmatprep.mubr.f32.mxu0 %v398_v25  ;;  %v462_v25 = vld [vmem:[%s2379_s6 + $0x2d8] sm:$0xff] }
 0x10d   : > { %728 = vmatmul.mubr.f32.gmra.mrb[12].mxu1 %v395_v26  ;;  %v459_v26 = vld [vmem:[%s2379_s6 + $0x2c0] sm:$0xff] }
 0x10e   : > { %985 = vmatmul.mubr.f32.gmra.mrb[12].mxu0 %v397_v27  ;;  %733 = vmatprep.mubr.f32.mxu1 %v400_v28  ;;  %v461_v27 = vld [vmem:[%s2379_s6 + $0x2d0] sm:$0xff]  ;;  %v464_v28 = vld [vmem:[%s2379_s6 + $0x2e8] sm:$0xff] }
 0x10f   : > { %990 = vmatprep.mubr.f32.mxu0 %v402_v29  ;;  %v466_v29 = vld [vmem:[%s2379_s6 + $0x2f8] sm:$0xff] }
 0x111   : > { %734 = vmatmul.mubr.f32.gmra.mrb[14].mxu1 %v399_v30  ;;  %v463_v30 = vld [vmem:[%s2379_s6 + $0x2e0] sm:$0xff] }
 0x112   : > { %991 = vmatmul.mubr.f32.gmra.mrb[14].mxu0 %v401_v31  ;;  %739 = vmatprep.mubr.f32.mxu1 %v404_v32  ;;  %v465_v31 = vld [vmem:[%s2379_s6 + $0x2f0] sm:$0xff]  ;;  %v468_v32 = vld [vmem:[%s2379_s6 + $0x308] sm:$0xff] }
 0x113   : > { %996 = vmatprep.mubr.f32.mxu0 %v406_v33  ;;  %v470_v33 = vld [vmem:[%s2379_s6 + $0x318] sm:$0xff] }
 0x115   : > { %740 = vmatmul.mubr.f32.gmra.mrb[16].mxu1 %v403_v34  ;;  %v467_v34 = vld [vmem:[%s2379_s6 + $0x300] sm:$0xff] }
 0x116   : > { %997 = vmatmul.mubr.f32.gmra.mrb[16].mxu0 %v405_v35  ;;  %745 = vmatprep.mubr.f32.mxu1 %v408_v36  ;;  %v469_v35 = vld [vmem:[%s2379_s6 + $0x310] sm:$0xff]  ;;  %v472_v36 = vld [vmem:[%s2379_s6 + $0x328] sm:$0xff] }
 0x117   : > { %1002 = vmatprep.mubr.f32.mxu0 %v410_v37  ;;  %v474_v37 = vld [vmem:[%s2379_s6 + $0x338] sm:$0xff] }
 0x119   : > { %746 = vmatmul.mubr.f32.gmra.mrb[18].mxu1 %v407_v38  ;;  %v471_v38 = vld [vmem:[%s2379_s6 + $0x320] sm:$0xff] }
 0x11a   : > { %1003 = vmatmul.mubr.f32.gmra.mrb[18].mxu0 %v409_v39  ;;  %751 = vmatprep.mubr.f32.mxu1 %v412_v40  ;;  %v473_v39 = vld [vmem:[%s2379_s6 + $0x330] sm:$0xff]  ;;  %v476_v40 = vld [vmem:[%s2379_s6 + $0x348] sm:$0xff] }
 0x11b   : > { %1008 = vmatprep.mubr.f32.mxu0 %v414_v41  ;;  %v478_v41 = vld [vmem:[%s2379_s6 + $0x358] sm:$0xff] }
 0x11d   : > { %752 = vmatmul.mubr.f32.gmra.mrb[20].mxu1 %v411_v42  ;;  %v475_v42 = vld [vmem:[%s2379_s6 + $0x340] sm:$0xff] }
 0x11e   : > { %1009 = vmatmul.mubr.f32.gmra.mrb[20].mxu0 %v413_v43  ;;  %757 = vmatprep.mubr.f32.mxu1 %v416_v44  ;;  %v477_v43 = vld [vmem:[%s2379_s6 + $0x350] sm:$0xff]  ;;  %v480_v44 = vld [vmem:[%s2379_s6 + $0x368] sm:$0xff] }
 0x11f   : > { %1014 = vmatprep.mubr.f32.mxu0 %v418_v45  ;;  %v482_v45 = vld [vmem:[%s2379_s6 + $0x378] sm:$0xff] }
 0x121   : > { %758 = vmatmul.mubr.f32.gmra.mrb[22].mxu1 %v415_v46  ;;  %v479_v46 = vld [vmem:[%s2379_s6 + $0x360] sm:$0xff] }
 0x122   : > { %1015 = vmatmul.mubr.f32.gmra.mrb[22].mxu0 %v417_v47  ;;  %763 = vmatprep.mubr.f32.mxu1 %v420_v48  ;;  %v481_v47 = vld [vmem:[%s2379_s6 + $0x370] sm:$0xff]  ;;  %v484_v48 = vld [vmem:[%s2379_s6 + $0x388] sm:$0xff] }
 0x123   : > { %1020 = vmatprep.mubr.f32.mxu0 %v422_v49  ;;  %v486_v49 = vld [vmem:[%s2379_s6 + $0x398] sm:$0xff] }
 0x125   : > { %764 = vmatmul.mubr.f32.gmra.mrb[24].mxu1 %v419_v50  ;;  %v483_v50 = vld [vmem:[%s2379_s6 + $0x380] sm:$0xff] }
 0x126   : > { %1021 = vmatmul.mubr.f32.gmra.mrb[24].mxu0 %v421_v51  ;;  %769 = vmatprep.mubr.f32.mxu1 %v424_v52  ;;  %v485_v51 = vld [vmem:[%s2379_s6 + $0x390] sm:$0xff]  ;;  %v488_v52 = vld [vmem:[%s2379_s6 + $0x3a8] sm:$0xff] }
 0x127   : > { %1026 = vmatprep.mubr.f32.mxu0 %v426_v53  ;;  %v490_v53 = vld [vmem:[%s2379_s6 + $0x3b8] sm:$0xff] }
 0x129   : > { %770 = vmatmul.mubr.f32.gmra.mrb[26].mxu1 %v423_v54  ;;  %v487_v54 = vld [vmem:[%s2379_s6 + $0x3a0] sm:$0xff] }
 0x12a   : > { %1027 = vmatmul.mubr.f32.gmra.mrb[26].mxu0 %v425_v55  ;;  %775 = vmatprep.mubr.f32.mxu1 %v428_v56  ;;  %v489_v55 = vld [vmem:[%s2379_s6 + $0x3b0] sm:$0xff]  ;;  %v492_v56 = vld [vmem:[%s2379_s6 + $0x3c8] sm:$0xff] }
 0x12b   : > { %1032 = vmatprep.mubr.f32.mxu0 %v430_v57  ;;  %v494_v57 = vld [vmem:[%s2379_s6 + $0x3d8] sm:$0xff] }
 0x12d   : > { %776 = vmatmul.mubr.f32.gmra.mrb[28].mxu1 %v427_v58  ;;  %v491_v58 = vld [vmem:[%s2379_s6 + $0x3c0] sm:$0xff] }
 0x12e   : > { %1033 = vmatmul.mubr.f32.gmra.mrb[28].mxu0 %v429_v59  ;;  %781 = vmatprep.mubr.f32.mxu1 %v432_v60  ;;  %v493_v59 = vld [vmem:[%s2379_s6 + $0x3d0] sm:$0xff]  ;;  %v496_v60 = vld [vmem:[%s2379_s6 + $0x3e8] sm:$0xff] }
 0x12f   : > { %1038 = vmatprep.mubr.f32.mxu0 %v434_v61  ;;  %v498_v61 = vld [vmem:[%s2379_s6 + $0x3f8] sm:$0xff] }
 0x131   : > { %782 = vmatmul.mubr.f32.gmra.mrb[30].mxu1 %v431_v62  ;;  %v495_v62 = vld [vmem:[%s2379_s6 + $0x3e0] sm:$0xff] }
 0x132   : > { %1039 = vmatmul.mubr.f32.gmra.mrb[30].mxu0 %v433_v63  ;;  %787 = vmatprep.mubr.f32.mxu1 %v436_v0  ;;  %v497_v63 = vld [vmem:[%s2379_s6 + $0x3f0] sm:$0xff]  ;;  %s2729_s6 = scalar_lea.sflag [#allocation5], %s230_s27 }
 0x133   : > { %1044 = vmatprep.mubr.f32.mxu0 %v438_v1 }
 0x135   : > { %788 = vmatmul.mubr.f32.gmra.mrb[32].mxu1 %v435_v2 }
 0x136   : > { %1045 = vmatmul.mubr.f32.gmra.mrb[32].mxu0 %v437_v3  ;;  %793 = vmatprep.mubr.f32.mxu1 %v440_v4 }
 0x137   : > { %1050 = vmatprep.mubr.f32.mxu0 %v442_v5 }
 0x139   : > { %794 = vmatmul.mubr.f32.gmra.mrb[34].mxu1 %v439_v6 }
 0x13a   : > { %1051 = vmatmul.mubr.f32.gmra.mrb[34].mxu0 %v441_v7  ;;  %799 = vmatprep.mubr.f32.mxu1 %v444_v8 }
 0x13b   : > { %1056 = vmatprep.mubr.f32.mxu0 %v446_v9 }
 0x13d   : > { %800 = vmatmul.mubr.f32.gmra.mrb[36].mxu1 %v443_v10 }
 0x13e   : > { %1057 = vmatmul.mubr.f32.gmra.mrb[36].mxu0 %v445_v11  ;;  %805 = vmatprep.mubr.f32.mxu1 %v448_v12 }
 0x13f   : > { %1062 = vmatprep.mubr.f32.mxu0 %v450_v13 }
 0x141   : > { %806 = vmatmul.mubr.f32.gmra.mrb[38].mxu1 %v447_v14 }
 0x142   : > { %1063 = vmatmul.mubr.f32.gmra.mrb[38].mxu0 %v449_v15  ;;  %811 = vmatprep.mubr.f32.mxu1 %v452_v16 }
 0x143   : > { %1068 = vmatprep.mubr.f32.mxu0 %v454_v17 }
 0x145   : > { %812 = vmatmul.mubr.f32.gmra.mrb[40].mxu1 %v451_v18 }
 0x146   : > { %1069 = vmatmul.mubr.f32.gmra.mrb[40].mxu0 %v453_v19  ;;  %817 = vmatprep.mubr.f32.mxu1 %v456_v20 }
 0x147   : > { %1074 = vmatprep.mubr.f32.mxu0 %v458_v21 }
 0x149   : > { %818 = vmatmul.mubr.f32.gmra.mrb[42].mxu1 %v455_v22 }
 0x14a   : > { %1075 = vmatmul.mubr.f32.gmra.mrb[42].mxu0 %v457_v23  ;;  %823 = vmatprep.mubr.f32.mxu1 %v460_v24 }
 0x14b   : > { %1080 = vmatprep.mubr.f32.mxu0 %v462_v25 }
 0x14d   : > { %824 = vmatmul.mubr.f32.gmra.mrb[44].mxu1 %v459_v26 }
 0x14e   : > { %1081 = vmatmul.mubr.f32.gmra.mrb[44].mxu0 %v461_v27  ;;  %829 = vmatprep.mubr.f32.mxu1 %v464_v28 }
 0x14f   : > { %1086 = vmatprep.mubr.f32.mxu0 %v466_v29 }
 0x151   : > { %830 = vmatmul.mubr.f32.gmra.mrb[46].mxu1 %v463_v30 }
 0x152   : > { %1087 = vmatmul.mubr.f32.gmra.mrb[46].mxu0 %v465_v31  ;;  %835 = vmatprep.mubr.f32.mxu1 %v468_v32 }
 0x153   : > { %1092 = vmatprep.mubr.f32.mxu0 %v470_v33 }
 0x155   : > { %836 = vmatmul.mubr.f32.gmra.mrb[48].mxu1 %v467_v34 }
 0x156   : > { %1093 = vmatmul.mubr.f32.gmra.mrb[48].mxu0 %v469_v35  ;;  %841 = vmatprep.mubr.f32.mxu1 %v472_v36 }
 0x157   : > { %1098 = vmatprep.mubr.f32.mxu0 %v474_v37 }
 0x159   : > { %842 = vmatmul.mubr.f32.gmra.mrb[50].mxu1 %v471_v38 }
 0x15a   : > { %1099 = vmatmul.mubr.f32.gmra.mrb[50].mxu0 %v473_v39  ;;  %847 = vmatprep.mubr.f32.mxu1 %v476_v40 }
 0x15b   : > { %1104 = vmatprep.mubr.f32.mxu0 %v478_v41 }
 0x15d   : > { %848 = vmatmul.mubr.f32.gmra.mrb[52].mxu1 %v475_v42 }
 0x15e   : > { %1105 = vmatmul.mubr.f32.gmra.mrb[52].mxu0 %v477_v43  ;;  %853 = vmatprep.mubr.f32.mxu1 %v480_v44 }
 0x15f   : > { %1110 = vmatprep.mubr.f32.mxu0 %v482_v45 }
 0x161   : > { %854 = vmatmul.mubr.f32.gmra.mrb[54].mxu1 %v479_v46 }
 0x162   : > { %1111 = vmatmul.mubr.f32.gmra.mrb[54].mxu0 %v481_v47  ;;  %859 = vmatprep.mubr.f32.mxu1 %v484_v48 }
 0x163   : > { %1116 = vmatprep.mubr.f32.mxu0 %v486_v49 }
 0x165   : > { %860 = vmatmul.mubr.f32.gmra.mrb[56].mxu1 %v483_v50 }
 0x166   : > { %1117 = vmatmul.mubr.f32.gmra.mrb[56].mxu0 %v485_v51  ;;  %865 = vmatprep.mubr.f32.mxu1 %v488_v52 }
 0x167   : > { %1122 = vmatprep.mubr.f32.mxu0 %v490_v53 }
 0x169   : > { %866 = vmatmul.mubr.f32.gmra.mrb[58].mxu1 %v487_v54 }
 0x16a   : > { %1123 = vmatmul.mubr.f32.gmra.mrb[58].mxu0 %v489_v55  ;;  %871 = vmatprep.mubr.f32.mxu1 %v492_v56 }
 0x16b   : > { %1128 = vmatprep.mubr.f32.mxu0 %v494_v57 }
 0x16d   : > { %872 = vmatmul.mubr.f32.gmra.mrb[60].mxu1 %v491_v58 }
 0x16e   : > { %1129 = vmatmul.mubr.f32.gmra.mrb[60].mxu0 %v493_v59  ;;  %877 = vmatprep.mubr.f32.mxu1 %v496_v60 }
 0x16f   : > { %1134 = vmatprep.mubr.f32.mxu0 %v498_v61 }
 0x171   : > { %878 = vmatmul.mubr.f32.gmra.mrb[62].mxu1 %v495_v62 }
 0x172   : > { %1135 = vmatmul.mubr.f32.gmra.mrb[62].mxu0 %v497_v63 }
 0x1c8   : > { %v693_v0 = vpop.f32.mrb[0].mxu1 }
 0x1c9   : > { %v950_v1 = vpop.f32.mrb[0].mxu0  ;;  %v695_v2 = vpop.f32.mrb[1].mxu1 }
 0x1ca   : > { %v951_v3 = vadd.f32 %v950_v1, %v693_v0  ;;  %v952_v4 = vpop.f32.mrb[1].mxu0 }
 0x1cb   : > { %v953_v5 = vadd.f32 %v952_v4, %v695_v2 }
 0x1cc   : > { %1336 = vst [vmem:[%s2651_s12] sm:$0xff] %v951_v3  ;;  %v699_v6 = vpop.f32.mrb[2].mxu1 }
 0x1cd   : > { %1337 = vst [vmem:[%s2651_s12 + $0x8] sm:$0xff] %v953_v5  ;;  %v956_v7 = vpop.f32.mrb[2].mxu0  ;;  %v701_v8 = vpop.f32.mrb[3].mxu1 }
 0x1ce   : > { %v957_v9 = vadd.f32 %v956_v7, %v699_v6  ;;  %v958_v10 = vpop.f32.mrb[3].mxu0 }
 0x1cf   : > { %v959_v11 = vadd.f32 %v958_v10, %v701_v8 }
 0x1d0   : > { %1338 = vst [vmem:[%s2651_s12 + $0x10] sm:$0xff] %v957_v9  ;;  %v705_v12 = vpop.f32.mrb[4].mxu1 }
 0x1d1   : > { %1339 = vst [vmem:[%s2651_s12 + $0x18] sm:$0xff] %v959_v11  ;;  %v962_v13 = vpop.f32.mrb[4].mxu0  ;;  %v707_v14 = vpop.f32.mrb[5].mxu1 }
 0x1d2   : > { %v963_v15 = vadd.f32 %v962_v13, %v705_v12  ;;  %v964_v16 = vpop.f32.mrb[5].mxu0 }
 0x1d3   : > { %v965_v17 = vadd.f32 %v964_v16, %v707_v14 }
 0x1d4   : > { %1340 = vst [vmem:[%s2651_s12 + $0x20] sm:$0xff] %v963_v15  ;;  %v711_v18 = vpop.f32.mrb[6].mxu1 }
 0x1d5   : > { %1341 = vst [vmem:[%s2651_s12 + $0x28] sm:$0xff] %v965_v17  ;;  %v968_v19 = vpop.f32.mrb[6].mxu0  ;;  %v713_v20 = vpop.f32.mrb[7].mxu1 }
 0x1d6   : > { %v969_v21 = vadd.f32 %v968_v19, %v711_v18  ;;  %v970_v22 = vpop.f32.mrb[7].mxu0 }
 0x1d7   : > { %v971_v23 = vadd.f32 %v970_v22, %v713_v20 }
 0x1d8   : > { %1342 = vst [vmem:[%s2651_s12 + $0x30] sm:$0xff] %v969_v21  ;;  %v717_v24 = vpop.f32.mrb[8].mxu1 }
 0x1d9   : > { %1343 = vst [vmem:[%s2651_s12 + $0x38] sm:$0xff] %v971_v23  ;;  %v974_v25 = vpop.f32.mrb[8].mxu0  ;;  %v719_v26 = vpop.f32.mrb[9].mxu1 }
 0x1da   : > { %v975_v27 = vadd.f32 %v974_v25, %v717_v24  ;;  %v976_v28 = vpop.f32.mrb[9].mxu0 }
 0x1db   : > { %v977_v29 = vadd.f32 %v976_v28, %v719_v26 }
 0x1dc   : > { %1344 = vst [vmem:[%s2651_s12 + $0x40] sm:$0xff] %v975_v27  ;;  %v723_v30 = vpop.f32.mrb[10].mxu1 }
 0x1dd   : > { %1345 = vst [vmem:[%s2651_s12 + $0x48] sm:$0xff] %v977_v29  ;;  %v980_v31 = vpop.f32.mrb[10].mxu0  ;;  %v725_v32 = vpop.f32.mrb[11].mxu1 }
 0x1de   : > { %v981_v33 = vadd.f32 %v980_v31, %v723_v30  ;;  %v982_v34 = vpop.f32.mrb[11].mxu0 }
 0x1df   : > { %v983_v35 = vadd.f32 %v982_v34, %v725_v32 }
 0x1e0   : > { %1346 = vst [vmem:[%s2651_s12 + $0x50] sm:$0xff] %v981_v33  ;;  %v729_v36 = vpop.f32.mrb[12].mxu1 }
 0x1e1   : > { %1347 = vst [vmem:[%s2651_s12 + $0x58] sm:$0xff] %v983_v35  ;;  %v986_v37 = vpop.f32.mrb[12].mxu0  ;;  %v731_v38 = vpop.f32.mrb[13].mxu1 }
 0x1e2   : > { %v987_v39 = vadd.f32 %v986_v37, %v729_v36  ;;  %v988_v40 = vpop.f32.mrb[13].mxu0 }
 0x1e3   : > { %v989_v41 = vadd.f32 %v988_v40, %v731_v38 }
 0x1e4   : > { %1348 = vst [vmem:[%s2651_s12 + $0x60] sm:$0xff] %v987_v39  ;;  %v735_v42 = vpop.f32.mrb[14].mxu1 }
 0x1e5   : > { %1349 = vst [vmem:[%s2651_s12 + $0x68] sm:$0xff] %v989_v41  ;;  %v992_v43 = vpop.f32.mrb[14].mxu0  ;;  %v737_v44 = vpop.f32.mrb[15].mxu1 }
 0x1e6   : > { %v993_v45 = vadd.f32 %v992_v43, %v735_v42  ;;  %v994_v46 = vpop.f32.mrb[15].mxu0 }
 0x1e7   : > { %v995_v47 = vadd.f32 %v994_v46, %v737_v44 }
 0x1e8   : > { %1350 = vst [vmem:[%s2651_s12 + $0x70] sm:$0xff] %v993_v45  ;;  %v741_v48 = vpop.f32.mrb[16].mxu1 }
 0x1e9   : > { %1351 = vst [vmem:[%s2651_s12 + $0x78] sm:$0xff] %v995_v47  ;;  %v998_v49 = vpop.f32.mrb[16].mxu0  ;;  %v743_v50 = vpop.f32.mrb[17].mxu1 }
 0x1ea   : > { %v999_v51 = vadd.f32 %v998_v49, %v741_v48  ;;  %v1000_v52 = vpop.f32.mrb[17].mxu0 }
 0x1eb   : > { %v1001_v53 = vadd.f32 %v1000_v52, %v743_v50 }
 0x1ec   : > { %1352 = vst [vmem:[%s2651_s12 + $0x80] sm:$0xff] %v999_v51  ;;  %v747_v54 = vpop.f32.mrb[18].mxu1 }
 0x1ed   : > { %1353 = vst [vmem:[%s2651_s12 + $0x88] sm:$0xff] %v1001_v53  ;;  %v1004_v55 = vpop.f32.mrb[18].mxu0  ;;  %v749_v56 = vpop.f32.mrb[19].mxu1 }
 0x1ee   : > { %v1005_v57 = vadd.f32 %v1004_v55, %v747_v54  ;;  %v1006_v58 = vpop.f32.mrb[19].mxu0 }
 0x1ef   : > { %v1007_v59 = vadd.f32 %v1006_v58, %v749_v56 }
 0x1f0   : > { %1354 = vst [vmem:[%s2651_s12 + $0x90] sm:$0xff] %v1005_v57  ;;  %v753_v60 = vpop.f32.mrb[20].mxu1 }
 0x1f1   : > { %1355 = vst [vmem:[%s2651_s12 + $0x98] sm:$0xff] %v1007_v59  ;;  %v1010_v61 = vpop.f32.mrb[20].mxu0  ;;  %v755_v62 = vpop.f32.mrb[21].mxu1 }
 0x1f2   : > { %v1011_v63 = vadd.f32 %v1010_v61, %v753_v60  ;;  %v1012_v0 = vpop.f32.mrb[21].mxu0 }
 0x1f3   : > { %v1013_v1 = vadd.f32 %v1012_v0, %v755_v62 }
 0x1f4   : > { %1356 = vst [vmem:[%s2651_s12 + $0xa0] sm:$0xff] %v1011_v63  ;;  %v759_v2 = vpop.f32.mrb[22].mxu1 }
 0x1f5   : > { %1357 = vst [vmem:[%s2651_s12 + $0xa8] sm:$0xff] %v1013_v1  ;;  %v1016_v3 = vpop.f32.mrb[22].mxu0  ;;  %v761_v4 = vpop.f32.mrb[23].mxu1 }
 0x1f6   : > { %v1017_v5 = vadd.f32 %v1016_v3, %v759_v2  ;;  %v1018_v6 = vpop.f32.mrb[23].mxu0 }
 0x1f7   : > { %v1019_v7 = vadd.f32 %v1018_v6, %v761_v4 }
 0x1f8   : > { %1358 = vst [vmem:[%s2651_s12 + $0xb0] sm:$0xff] %v1017_v5  ;;  %v765_v8 = vpop.f32.mrb[24].mxu1 }
 0x1f9   : > { %1359 = vst [vmem:[%s2651_s12 + $0xb8] sm:$0xff] %v1019_v7  ;;  %v1022_v9 = vpop.f32.mrb[24].mxu0  ;;  %v767_v10 = vpop.f32.mrb[25].mxu1 }
 0x1fa   : > { %v1023_v11 = vadd.f32 %v1022_v9, %v765_v8  ;;  %v1024_v12 = vpop.f32.mrb[25].mxu0 }
 0x1fb   : > { %v1025_v13 = vadd.f32 %v1024_v12, %v767_v10 }
 0x1fc   : > { %1360 = vst [vmem:[%s2651_s12 + $0xc0] sm:$0xff] %v1023_v11  ;;  %v771_v14 = vpop.f32.mrb[26].mxu1 }
 0x1fd   : > { %1361 = vst [vmem:[%s2651_s12 + $0xc8] sm:$0xff] %v1025_v13  ;;  %v1028_v15 = vpop.f32.mrb[26].mxu0  ;;  %v773_v16 = vpop.f32.mrb[27].mxu1 }
 0x1fe   : > { %v1029_v17 = vadd.f32 %v1028_v15, %v771_v14  ;;  %v1030_v18 = vpop.f32.mrb[27].mxu0 }
 0x1ff   : > { %v1031_v19 = vadd.f32 %v1030_v18, %v773_v16 }
 0x200   : > { %1362 = vst [vmem:[%s2651_s12 + $0xd0] sm:$0xff] %v1029_v17  ;;  %v777_v20 = vpop.f32.mrb[28].mxu1 }
 0x201   : > { %1363 = vst [vmem:[%s2651_s12 + $0xd8] sm:$0xff] %v1031_v19  ;;  %v1034_v21 = vpop.f32.mrb[28].mxu0  ;;  %v779_v22 = vpop.f32.mrb[29].mxu1 }
 0x202   : > { %v1035_v23 = vadd.f32 %v1034_v21, %v777_v20  ;;  %v1036_v24 = vpop.f32.mrb[29].mxu0 }
 0x203   : > { %v1037_v25 = vadd.f32 %v1036_v24, %v779_v22 }
 0x204   : > { %1364 = vst [vmem:[%s2651_s12 + $0xe0] sm:$0xff] %v1035_v23  ;;  %v783_v26 = vpop.f32.mrb[30].mxu1 }
 0x205   : > { %1365 = vst [vmem:[%s2651_s12 + $0xe8] sm:$0xff] %v1037_v25  ;;  %v1040_v27 = vpop.f32.mrb[30].mxu0  ;;  %v785_v28 = vpop.f32.mrb[31].mxu1 }
 0x206   : > { %v1041_v29 = vadd.f32 %v1040_v27, %v783_v26  ;;  %v1042_v30 = vpop.f32.mrb[31].mxu0 }
 0x207   : > { %v1043_v31 = vadd.f32 %v1042_v30, %v785_v28 }
 0x208   : > { %1366 = vst [vmem:[%s2651_s12 + $0xf0] sm:$0xff] %v1041_v29  ;;  %v789_v32 = vpop.f32.mrb[32].mxu1 }
 0x209   : > { %1367 = vst [vmem:[%s2651_s12 + $0xf8] sm:$0xff] %v1043_v31  ;;  %v1046_v33 = vpop.f32.mrb[32].mxu0  ;;  %v791_v34 = vpop.f32.mrb[33].mxu1 }
 0x20a   : > { %v1047_v35 = vadd.f32 %v1046_v33, %v789_v32  ;;  %v1048_v36 = vpop.f32.mrb[33].mxu0 }
 0x20b   : > { %v1049_v37 = vadd.f32 %v1048_v36, %v791_v34 }
 0x20c   : > { %1368 = vst [vmem:[%s2651_s12 + $0x100] sm:$0xff] %v1047_v35  ;;  %v795_v38 = vpop.f32.mrb[34].mxu1 }
 0x20d   : > { %1369 = vst [vmem:[%s2651_s12 + $0x108] sm:$0xff] %v1049_v37  ;;  %v1052_v39 = vpop.f32.mrb[34].mxu0  ;;  %v797_v40 = vpop.f32.mrb[35].mxu1 }
 0x20e   : > { %v1053_v41 = vadd.f32 %v1052_v39, %v795_v38  ;;  %v1054_v42 = vpop.f32.mrb[35].mxu0 }
 0x20f   : > { %v1055_v43 = vadd.f32 %v1054_v42, %v797_v40 }
 0x210   : > { %1370 = vst [vmem:[%s2651_s12 + $0x110] sm:$0xff] %v1053_v41  ;;  %v801_v44 = vpop.f32.mrb[36].mxu1 }
 0x211   : > { %1371 = vst [vmem:[%s2651_s12 + $0x118] sm:$0xff] %v1055_v43  ;;  %v1058_v45 = vpop.f32.mrb[36].mxu0  ;;  %v803_v46 = vpop.f32.mrb[37].mxu1 }
 0x212   : > { %v1059_v47 = vadd.f32 %v1058_v45, %v801_v44  ;;  %v1060_v48 = vpop.f32.mrb[37].mxu0 }
 0x213   : > { %v1061_v49 = vadd.f32 %v1060_v48, %v803_v46 }
 0x214   : > { %1372 = vst [vmem:[%s2651_s12 + $0x120] sm:$0xff] %v1059_v47  ;;  %v807_v50 = vpop.f32.mrb[38].mxu1 }
 0x215   : > { %1373 = vst [vmem:[%s2651_s12 + $0x128] sm:$0xff] %v1061_v49  ;;  %v1064_v51 = vpop.f32.mrb[38].mxu0  ;;  %v809_v52 = vpop.f32.mrb[39].mxu1 }
 0x216   : > { %v1065_v53 = vadd.f32 %v1064_v51, %v807_v50  ;;  %v1066_v54 = vpop.f32.mrb[39].mxu0 }
 0x217   : > { %v1067_v55 = vadd.f32 %v1066_v54, %v809_v52 }
 0x218   : > { %1374 = vst [vmem:[%s2651_s12 + $0x130] sm:$0xff] %v1065_v53  ;;  %v813_v56 = vpop.f32.mrb[40].mxu1 }
 0x219   : > { %1375 = vst [vmem:[%s2651_s12 + $0x138] sm:$0xff] %v1067_v55  ;;  %v1070_v57 = vpop.f32.mrb[40].mxu0  ;;  %v815_v58 = vpop.f32.mrb[41].mxu1 }
 0x21a   : > { %v1071_v59 = vadd.f32 %v1070_v57, %v813_v56  ;;  %v1072_v60 = vpop.f32.mrb[41].mxu0 }
 0x21b   : > { %v1073_v61 = vadd.f32 %v1072_v60, %v815_v58 }
 0x21c   : > { %1376 = vst [vmem:[%s2651_s12 + $0x140] sm:$0xff] %v1071_v59  ;;  %v819_v62 = vpop.f32.mrb[42].mxu1 }
 0x21d   : > { %1377 = vst [vmem:[%s2651_s12 + $0x148] sm:$0xff] %v1073_v61  ;;  %v1076_v63 = vpop.f32.mrb[42].mxu0  ;;  %v821_v0 = vpop.f32.mrb[43].mxu1 }
 0x21e   : > { %v1077_v1 = vadd.f32 %v1076_v63, %v819_v62  ;;  %v1078_v2 = vpop.f32.mrb[43].mxu0 }
 0x21f   : > { %v1079_v3 = vadd.f32 %v1078_v2, %v821_v0 }
 0x220   : > { %1378 = vst [vmem:[%s2651_s12 + $0x150] sm:$0xff] %v1077_v1  ;;  %v825_v4 = vpop.f32.mrb[44].mxu1 }
 0x221   : > { %1379 = vst [vmem:[%s2651_s12 + $0x158] sm:$0xff] %v1079_v3  ;;  %v1082_v5 = vpop.f32.mrb[44].mxu0  ;;  %v827_v6 = vpop.f32.mrb[45].mxu1 }
 0x222   : > { %v1083_v7 = vadd.f32 %v1082_v5, %v825_v4  ;;  %v1084_v8 = vpop.f32.mrb[45].mxu0 }
 0x223   : > { %v1085_v9 = vadd.f32 %v1084_v8, %v827_v6 }
 0x224   : > { %1380 = vst [vmem:[%s2651_s12 + $0x160] sm:$0xff] %v1083_v7  ;;  %v831_v10 = vpop.f32.mrb[46].mxu1 }
 0x225   : > { %1381 = vst [vmem:[%s2651_s12 + $0x168] sm:$0xff] %v1085_v9  ;;  %v1088_v11 = vpop.f32.mrb[46].mxu0  ;;  %v833_v12 = vpop.f32.mrb[47].mxu1 }
 0x226   : > { %v1089_v13 = vadd.f32 %v1088_v11, %v831_v10  ;;  %v1090_v14 = vpop.f32.mrb[47].mxu0 }
 0x227   : > { %v1091_v15 = vadd.f32 %v1090_v14, %v833_v12 }
 0x228   : > { %1382 = vst [vmem:[%s2651_s12 + $0x170] sm:$0xff] %v1089_v13  ;;  %v837_v16 = vpop.f32.mrb[48].mxu1 }
 0x229   : > { %1383 = vst [vmem:[%s2651_s12 + $0x178] sm:$0xff] %v1091_v15  ;;  %v1094_v17 = vpop.f32.mrb[48].mxu0  ;;  %v839_v18 = vpop.f32.mrb[49].mxu1 }
 0x22a   : > { %v1095_v19 = vadd.f32 %v1094_v17, %v837_v16  ;;  %v1096_v20 = vpop.f32.mrb[49].mxu0 }
 0x22b   : > { %v1097_v21 = vadd.f32 %v1096_v20, %v839_v18 }
 0x22c   : > { %1384 = vst [vmem:[%s2651_s12 + $0x180] sm:$0xff] %v1095_v19  ;;  %v843_v22 = vpop.f32.mrb[50].mxu1 }
 0x22d   : > { %1385 = vst [vmem:[%s2651_s12 + $0x188] sm:$0xff] %v1097_v21  ;;  %v1100_v23 = vpop.f32.mrb[50].mxu0  ;;  %v845_v24 = vpop.f32.mrb[51].mxu1 }
 0x22e   : > { %v1101_v25 = vadd.f32 %v1100_v23, %v843_v22  ;;  %v1102_v26 = vpop.f32.mrb[51].mxu0 }
 0x22f   : > { %v1103_v27 = vadd.f32 %v1102_v26, %v845_v24 }
 0x230   : > { %1386 = vst [vmem:[%s2651_s12 + $0x190] sm:$0xff] %v1101_v25  ;;  %v849_v28 = vpop.f32.mrb[52].mxu1 }
 0x231   : > { %1387 = vst [vmem:[%s2651_s12 + $0x198] sm:$0xff] %v1103_v27  ;;  %v1106_v29 = vpop.f32.mrb[52].mxu0  ;;  %v851_v30 = vpop.f32.mrb[53].mxu1 }
 0x232   : > { %v1107_v31 = vadd.f32 %v1106_v29, %v849_v28  ;;  %v1108_v32 = vpop.f32.mrb[53].mxu0 }
 0x233   : > { %v1109_v33 = vadd.f32 %v1108_v32, %v851_v30 }
 0x234   : > { %1388 = vst [vmem:[%s2651_s12 + $0x1a0] sm:$0xff] %v1107_v31  ;;  %v855_v34 = vpop.f32.mrb[54].mxu1 }
 0x235   : > { %1389 = vst [vmem:[%s2651_s12 + $0x1a8] sm:$0xff] %v1109_v33  ;;  %v1112_v35 = vpop.f32.mrb[54].mxu0  ;;  %v857_v36 = vpop.f32.mrb[55].mxu1 }
 0x236   : > { %v1113_v37 = vadd.f32 %v1112_v35, %v855_v34  ;;  %v1114_v38 = vpop.f32.mrb[55].mxu0 }
 0x237   : > { %v1115_v39 = vadd.f32 %v1114_v38, %v857_v36 }
 0x238   : > { %1390 = vst [vmem:[%s2651_s12 + $0x1b0] sm:$0xff] %v1113_v37  ;;  %v861_v40 = vpop.f32.mrb[56].mxu1 }
 0x239   : > { %1391 = vst [vmem:[%s2651_s12 + $0x1b8] sm:$0xff] %v1115_v39  ;;  %v1118_v41 = vpop.f32.mrb[56].mxu0  ;;  %v863_v42 = vpop.f32.mrb[57].mxu1 }
 0x23a   : > { %v1119_v43 = vadd.f32 %v1118_v41, %v861_v40  ;;  %v1120_v44 = vpop.f32.mrb[57].mxu0 }
 0x23b   : > { %v1121_v45 = vadd.f32 %v1120_v44, %v863_v42 }
 0x23c   : > { %1392 = vst [vmem:[%s2651_s12 + $0x1c0] sm:$0xff] %v1119_v43  ;;  %v867_v46 = vpop.f32.mrb[58].mxu1 }
 0x23d   : > { %1393 = vst [vmem:[%s2651_s12 + $0x1c8] sm:$0xff] %v1121_v45  ;;  %v1124_v47 = vpop.f32.mrb[58].mxu0  ;;  %v869_v48 = vpop.f32.mrb[59].mxu1 }
 0x23e   : > { %v1125_v49 = vadd.f32 %v1124_v47, %v867_v46  ;;  %v1126_v50 = vpop.f32.mrb[59].mxu0 }
 0x23f   : > { %v1127_v51 = vadd.f32 %v1126_v50, %v869_v48 }
 0x240   : > { %1394 = vst [vmem:[%s2651_s12 + $0x1d0] sm:$0xff] %v1125_v49  ;;  %v873_v52 = vpop.f32.mrb[60].mxu1 }
 0x241   : > { %1395 = vst [vmem:[%s2651_s12 + $0x1d8] sm:$0xff] %v1127_v51  ;;  %v1130_v53 = vpop.f32.mrb[60].mxu0  ;;  %v875_v54 = vpop.f32.mrb[61].mxu1 }
 0x242   : > { %v1131_v55 = vadd.f32 %v1130_v53, %v873_v52  ;;  %v1132_v56 = vpop.f32.mrb[61].mxu0 }
 0x243   : > { %v1133_v57 = vadd.f32 %v1132_v56, %v875_v54 }
 0x244   : > { %1396 = vst [vmem:[%s2651_s12 + $0x1e0] sm:$0xff] %v1131_v55  ;;  %v879_v58 = vpop.f32.mrb[62].mxu1 }
 0x245   : > { %1397 = vst [vmem:[%s2651_s12 + $0x1e8] sm:$0xff] %v1133_v57  ;;  %v1136_v59 = vpop.f32.mrb[62].mxu0  ;;  %v881_v60 = vpop.f32.mrb[63].mxu1 }
 0x246   : > { %v1137_v61 = vadd.f32 %v1136_v59, %v879_v58  ;;  %v1138_v62 = vpop.f32.mrb[63].mxu0 }
 0x247   : > { %v1139_v63 = vadd.f32 %v1138_v62, %v881_v60 }
 0x248   : > { %1398 = vst [vmem:[%s2651_s12 + $0x1f0] sm:$0xff] %v1137_v61 }
 0x249   : > { %1399 = vst [vmem:[%s2651_s12 + $0x1f8] sm:$0xff] %v1139_v63 }
 0x24a   : > { %1965 = shalt.err (!%p1962_p8)
}
 0x24b   : > { %s1966_s27 = scalar_lea.hbm %s2721_s29, 8192  ;;  %s1970_s7 = scalar_lea.hbm %s2807_s2, 65536 }
 0x24c   : > { %p1967_p0 = scmp.ne.s32.totalorder %s2721_s29, %s1966_s27  ;;  %p1971_p7 = scmp.lt.u32.totalorder %s2721_s29, %s2807_s2 }
 0x24d   : > { %p1972_p10 = scmp.lt.u32.totalorder %s1970_s7, %s1966_s27  ;;  %p1974_p13 = scmp.lt.u32.totalorder %s1966_s27, %s2721_s29 }
 0x24e   : > { %p1968_p1 = pnand %p1967_p0, %p2841_p6 }
 0x24f   : > { %p1973_p9 = por %p1972_p10, %p1971_p7 }
 0x250   : > { %p1969_p5 = pneg %p1968_p1 }
 0x251   : > { %p1975_p4 = por %p1974_p13, %p1973_p9 }
 0x253   : > { %p1976_p12 = pnand %p1975_p4, %p1969_p5 }
 0x255   : > { %1979 = shalt.err (!%p1976_p12)
}
 0x256   : > { %s2109_s18 = smov 256   ;;  %s2110_s26 = smov 1024  }
 0x257   : > { %s2111_s24 = smov 16  }
 0x258   : > { %1760 = dma.vmem_to_hbm [thread:$0]  (%p2841_p6), %s2723_s19, 8192, %s2721_s29, %s2729_s6, %s2109_s18, %s2110_s26, %s2111_s24  }
 0x259 PF: > { %p1774_p3 = scmp.ge.s32.totalorder %s2102_s22, 2  ;;  %s1432_s8 = sand.u32 1, %s2050_s9  }
 0x25a   : > { %p2842_p2 = scmp.ne.s32.totalorder %s2834_s5, 0  ;;  %s1433_s20 = scalar_lea.sflag [#allocation5], %s1432_s8 }
 0x25c   : > { %p1770_p11 = pnand %p1774_p3, %p2842_p2 }
 0x25e   : > { %2045 = dma.done.wait (!%p1770_p11), %s1433_s20, 8192  }
 0x25f   : > { %2047 = vsyncadd (!%p1770_p11), %s1433_s20, 4294959104  ;;  %s21_s22 = sadd.s32 1, %s2102_s22   ;;  %s2844_s18 = sld [smem:[#allocation12_spill]] }
 0x260   : > { %p2758_p8 = scmp.ge.s32.totalorder %s21_s22, 10   ;;  %s2845_s19 = sld [smem:[#allocation13_spill]] }
 0x261   : > { %s2846_s20 = sld [smem:[#allocation14_spill]]  ;;  %s2847_s21 = sld [smem:[#allocation15_spill]] }
 0x262   : > { %s2848_s9 = smov %s2054_s10  ;;  %s2849_s10 = smov %s2058_s11 }
 0x263   : > { %s2850_s11 = smov %s2319_s0  ;;  %s2851_s12 = smov %s2066_s13 }
 0x264   : > { %s2852_s13 = smov %s2070_s14  ;;  %s2853_s14 = smov %s2301_s15 }
 0x265   : > { %s2854_s15 = smov %s2078_s16  ;;  %s2855_s16 = smov %s2082_s17 }
 0x266   : > { %s2856_s17 = smov %s2316_s4  ;;  %20 = sbr.rel (!%p2758_p8) target bundleno = 14 (0xe), region = 94 }
 0x26d   :  { %1438 = vsyncpa [#allocation4], 1 }
 0x26e   :  { %1440 = vsyncpa [#allocation4 + $0x1], 1 }
 0x26f   :  { %1441 = vsyncpa [#allocation7], 1 }
 0x270   :  { %1443 = vsyncpa [#allocation7 + $0x1], 1 }
 0x271   :  { %1444 = vsyncpa [#allocation5], 1 }
 0x272   :  { %1446 = vsyncpa [#allocation5 + $0x1], 1 }

</bundles_post_ra>
